<compile_context>
chip_gen: v6e
topology: v6e:2x2x1
jax: 0.10.0
libtpu: 0.0.40
codegen_flags: <defaults>
</compile_context>

<pallas_src>
import functools

import jax
import jax.numpy as jnp
from jax import lax
from jax.experimental import pallas as pl
from jax.experimental.pallas import tpu as pltpu


def _vp_kernel(lens_ref, x_ref, w1_ref, w2_ref, pk_ref, o_ref,
               *, k_size, pad, eps, bt, t):
    """Fused VariancePredictor forward for one batch tile (bt elements).

    lens_ref : (B_pad,) int32 in SMEM (scalar-prefetched sequence lengths)
    x_ref    : (C_in, bt*T)  folded channels-first slab; lane j = b_local*T + time
    w1_ref   : (C_f, K*C_in) conv1 weight, im2col layout (co, k, ci)
    w2_ref   : (C_f, K*C_f)  conv2 weight, im2col layout
    pk_ref   : (C_f, 8) f32  packed [b1, g1, be1, b2, g2, be2, w_lin, b_lin]
    o_ref    : (bt, T) f32   output tile (lane-/sublane-dense)
    """
    n = bt * t
    offs = tuple(k - pad for k in range(k_size))            # (-1, 0, +1)

    # ---- loop-invariant pieces: computed ONCE per grid step ----
    tmod = lax.broadcasted_iota(jnp.int32, (1, n), 1) % t   # time index per lane
    valid = {d: jnp.logical_and(tmod + d >= 0, tmod + d < t)
             for d in offs if d != 0}

    def shift(a, d):
        # out[:, j] = a[:, j + d] within each length-T segment, else 0
        # (positions that would cross a batch boundary are masked to zero,
        #  matching the conv's zero padding).
        if d == 0:
            return a
        rolled = pltpu.roll(a, (-d) % n, 1)
        return jnp.where(valid[d], rolled, jnp.zeros_like(rolled))

    p = pk_ref[...]                                         # (C_f, 8) f32
    b1, g1, be1 = p[:, 0:1], p[:, 1:2], p[:, 2:3]
    b2, g2, be2 = p[:, 3:4], p[:, 4:5], p[:, 5:6]
    wl, bl = p[:, 6:7], p[0:1, 7:8]

    x = x_ref[...]                                          # (C_in, bt*T)

    # ---- conv1d_1 (im2col, single MXU matmul) + bias + ReLU ----
    xcol = jnp.concatenate([shift(x, d) for d in offs], axis=0)      # (K*C_in, N)
    y = jnp.dot(w1_ref[...], xcol, preferred_element_type=jnp.float32)
    y = jnp.maximum(y + b1, 0.0)                                     # (C_f, N) f32

    # ---- layer_norm_1 (over channel axis = sublanes) ----
    mu = jnp.mean(y, axis=0, keepdims=True)
    var = jnp.mean((y - mu) * (y - mu), axis=0, keepdims=True)
    y = (y - mu) * lax.rsqrt(var + eps) * g1 + be1
    # TODO(synk): dropout_1/dropout_2 are identity at inference; no RNG applied.

    # ---- conv1d_2 (im2col, single MXU matmul) + bias + ReLU ----
    ycol = jnp.concatenate([shift(y, d) for d in offs],
                           axis=0).astype(w2_ref.dtype)              # (K*C_f, N)
    z = jnp.dot(w2_ref[...], ycol, preferred_element_type=jnp.float32)
    z = jnp.maximum(z + b2, 0.0)

    # ---- layer_norm_2 ----
    mu = jnp.mean(z, axis=0, keepdims=True)
    var = jnp.mean((z - mu) * (z - mu), axis=0, keepdims=True)
    z = (z - mu) * lax.rsqrt(var + eps) * g2 + be2

    # ---- linear_layer (C_f -> 1): VPU mul + sublane reduce ----
    o = jnp.sum(wl * z, axis=0, keepdims=True) + bl                  # (1, N)

    # ---- masked_fill(time >= length, 0.0) + dense (bt, T) store ----
    o2 = o.reshape(bt, t)
    time_idx = lax.broadcasted_iota(jnp.int32, (bt, t), 1)
    row_idx = lax.broadcasted_iota(jnp.int32, (bt, t), 0)
    base = pl.program_id(0) * bt
    lens = jnp.zeros((bt, t), jnp.int32)
    for r in range(bt):                    # bt is static & small: cheap selects
        lens = jnp.where(row_idx == r, lens_ref[base + r], lens)
    o_ref[...] = jnp.where(time_idx >= lens, 0.0, o2).astype(o_ref.dtype)


def variance_predictor_forward(x, lengths, params, *, batch_tile=None,
                               compute_dtype=jnp.float32):
    """x: (B, T, C_in) encoder output.

    lengths: (B,) int — valid length per sequence. The padding mask applied at
             the end is `time >= length` (FastSpeech2's get_mask_from_lengths);
             pass None for no masking.
    Returns (B, T) float32.
    """
    b, t, c_in = x.shape
    c_f, c_in_w, k_size = params["w1"].shape
    assert c_in_w == c_in
    pad1 = (k_size - 1) // 2
    pad2 = 1                      # hardcoded in the PyTorch module for conv1d_2
    assert k_size == 3 and pad1 == pad2, \
        "kernel written for kernel_size=3, shape-preserving convs"

    # Coarsen the grid: big batch tiles amortize the ~0.35us/step overhead;
    # default keeps >= 2 grid steps when B > 8 so v7x megacore shards the batch.
    if batch_tile is None:
        batch_tile = 8 if b > 8 else b
    # (batch_tile should be a multiple of 8 or equal the padded batch so the
    #  (batch_tile, T) output tile stays sublane-dense.)

    t_pad = ((t + 127) // 128) * 128              # lane-dense 128-multiple blocks
    b_pad = pl.cdiv(b, batch_tile) * batch_tile

    # ---- wrapper-side layout plumbing: (B, T, C) -> (C, B*T), lane = time ----
    x_p = x
    if (b_pad, t_pad) != (b, t):
        x_p = jnp.pad(x, ((0, b_pad - b), (0, t_pad - t), (0, 0)))
    x_fold = jnp.transpose(x_p, (2, 0, 1)).reshape(
        c_in, b_pad * t_pad).astype(compute_dtype)

    w1_col = jnp.transpose(params["w1"], (0, 2, 1)).reshape(
        c_f, k_size * c_in).astype(compute_dtype)           # (C_f, K*C_in)
    w2_col = jnp.transpose(params["w2"], (0, 2, 1)).reshape(
        c_f, k_size * c_f).astype(compute_dtype)            # (C_f, K*C_f)

    # ---- pack the 7 per-channel param vectors + linear bias into (C_f, 8) ----
    pk = jnp.stack([
        params["b1"], params["g1"], params["beta1"],
        params["b2"], params["g2"], params["beta2"],
        params["w_lin"].reshape(c_f),
        jnp.broadcast_to(params["b_lin"].reshape(()), (c_f,)),
    ], axis=1).astype(jnp.float32)                          # (C_f, 8)

    if lengths is None:
        lengths = jnp.full((b,), t, jnp.int32)
    lens = lengths.astype(jnp.int32)
    if b_pad != b:
        lens = jnp.concatenate([lens, jnp.zeros((b_pad - b,), jnp.int32)])

    kernel = functools.partial(_vp_kernel, k_size=k_size, pad=pad1,
                               eps=1e-5, bt=batch_tile, t=t_pad)

    n_blk = batch_tile * t_pad
    bcast = lambda shape: pl.BlockSpec(shape, lambda i, _: (0, 0))

    out = pl.pallas_call(
        kernel,
        out_shape=jax.ShapeDtypeStruct((b_pad, t_pad), jnp.float32),
        grid_spec=pltpu.PrefetchScalarGridSpec(
            num_scalar_prefetch=1,                          # lengths -> SMEM
            grid=(b_pad // batch_tile,),
            in_specs=[
                pl.BlockSpec((c_in, n_blk), lambda i, _: (0, i)),
                bcast((c_f, k_size * c_in)),
                bcast((c_f, k_size * c_f)),
                bcast((c_f, 8)),
            ],
            out_specs=pl.BlockSpec((batch_tile, t_pad), lambda i, _: (i, 0)),
        ),
        compiler_params=pltpu.CompilerParams(
            dimension_semantics=("parallel",),
        ),
    )(lens, x_fold, w1_col, w2_col, pk)
    return out[:b, :t]


# ----------------------------- pure-JAX reference -----------------------------
def _reference(x, mask, p):
    def conv1d(h, w, bias, pad):
        y = lax.conv_general_dilated(
            jnp.transpose(h, (0, 2, 1)), w, (1,), ((pad, pad),),
            dimension_numbers=("NCH", "OIH", "NCH"))
        y = y + bias[None, :, None]
        return jnp.transpose(y, (0, 2, 1))

    def layernorm(h, g, beta, eps=1e-5):
        mu = jnp.mean(h, -1, keepdims=True)
        var = jnp.mean((h - mu) ** 2, -1, keepdims=True)
        return (h - mu) * lax.rsqrt(var + eps) * g + beta

    k = p["w1"].shape[2]
    h = conv1d(x, p["w1"], p["b1"], (k - 1) // 2)
    h = jnp.maximum(h, 0.0)
    h = layernorm(h, p["g1"], p["beta1"])
    h = conv1d(h, p["w2"], p["b2"], 1)
    h = jnp.maximum(h, 0.0)
    h = layernorm(h, p["g2"], p["beta2"])
    out = (h @ p["w_lin"].T + p["b_lin"])[..., 0]
    if mask is not None:
        out = jnp.where(mask, 0.0, out)
    return out


if __name__ == "__main__":
    B, T = 16, 128         # batch_tile=8 -> grid of 2 (v7x megacore), N = 1024
    C_IN = 8               # encoder_hidden
    C_F = 16               # variance_predictor filter_size
    K = 3

    key = jax.random.PRNGKey(0)
    ks = jax.random.split(key, 12)

    def xavier(k, shape, fan_in, fan_out):
        lim = (6.0 / (fan_in + fan_out)) ** 0.5
        return jax.random.uniform(k, shape, minval=-lim, maxval=lim,
                                  dtype=jnp.float32)

    params = {
        "w1": xavier(ks[0], (C_F, C_IN, K), C_IN * K, C_F * K),
        "b1": jax.random.uniform(ks[1], (C_F,), minval=-0.1, maxval=0.1,
                                 dtype=jnp.float32),
        "g1": 1.0 + 0.1 * jax.random.normal(ks[2], (C_F,), dtype=jnp.float32),
        "beta1": 0.1 * jax.random.normal(ks[3], (C_F,), dtype=jnp.float32),
        "w2": xavier(ks[4], (C_F, C_F, K), C_F * K, C_F * K),
        "b2": jax.random.uniform(ks[5], (C_F,), minval=-0.1, maxval=0.1,
                                 dtype=jnp.float32),
        "g2": 1.0 + 0.1 * jax.random.normal(ks[6], (C_F,), dtype=jnp.float32),
        "beta2": 0.1 * jax.random.normal(ks[7], (C_F,), dtype=jnp.float32),
        "w_lin": xavier(ks[8], (1, C_F), C_F, 1),
        "b_lin": jax.random.uniform(ks[9], (1,), minval=-0.1, maxval=0.1,
                                    dtype=jnp.float32),
    }

    x = jax.random.normal(ks[10], (B, T, C_IN), dtype=jnp.float32)
    lengths = jnp.concatenate([
        jnp.full((B // 2,), T, dtype=jnp.int32),
        jax.random.randint(ks[11], (B - B // 2,), T // 2, T + 1).astype(jnp.int32),
    ])

    y = variance_predictor_forward(x, lengths, params)
    jax.block_until_ready(y)

    mask = jnp.arange(T, dtype=jnp.int32)[None, :] >= lengths[:, None]  # (B, T)
    y_ref = _reference(x, mask, params)
    assert y.shape == y_ref.shape, (y.shape, y_ref.shape)
    err = float(jnp.max(jnp.abs(y - y_ref)))
    assert jnp.allclose(y, y_ref, atol=1e-4, rtol=1e-4), err

    print("KERNEL_OK")
</pallas_src>

<mosaic_0001>
module attributes {stable_mosaic.version = 11 : i64} {
  func.func @_vp_kernel(%arg0: i32, %arg1: memref<16xi32, #tpu.memory_space<smem>>, %arg2: memref<8x1024xf32, #tpu.memory_space<vmem>>, %arg3: memref<16x24xf32, #tpu.memory_space<vmem>>, %arg4: memref<16x48xf32, #tpu.memory_space<vmem>>, %arg5: memref<16x8xf32, #tpu.memory_space<vmem>>, %arg6: memref<8x128xf32, #tpu.memory_space<vmem>>) attributes {dimension_semantics = [#tpu.dimension_semantics<parallel>], iteration_bounds = array<i64: 2>, scalar_prefetch = 1 : i64, scratch_operands = 0 : i64, tpu.core_type = #tpu.core_type<tc>, window_params = [{transform_indices = @transform_0, window_bounds = array<i64: 8, 1024>}, {pipeline_mode = #tpu.pipeline_mode<synchronous>, transform_indices = @transform_1, window_bounds = array<i64: 16, 24>}, {pipeline_mode = #tpu.pipeline_mode<synchronous>, transform_indices = @transform_2, window_bounds = array<i64: 16, 48>}, {pipeline_mode = #tpu.pipeline_mode<synchronous>, transform_indices = @transform_3, window_bounds = array<i64: 16, 8>}, {transform_indices = @transform_4, window_bounds = array<i64: 8, 128>}]} {
    %0 = tpu.iota {dimensions = array<i32: 1>} : vector<1x1024xi32>
    %c128_i32 = arith.constant 128 : i32
    %c0_i32 = arith.constant 0 : i32
    %1 = arith.cmpi eq, %c128_i32, %c0_i32 : i32
    %c1_i32 = arith.constant 1 : i32
    %2 = arith.select %1, %c1_i32, %c128_i32 : i32
    %3 = vector.broadcast %2 : i32 to vector<1x1024xi32>
    %4 = arith.remsi %0, %3 : vector<1x1024xi32>
    %c0_i32_0 = arith.constant 0 : i32
    %5 = vector.broadcast %c0_i32_0 : i32 to vector<1x1024xi32>
    %6 = arith.cmpi ne, %4, %5 : vector<1x1024xi32>
    %c0_i32_1 = arith.constant 0 : i32
    %7 = vector.broadcast %c0_i32_1 : i32 to vector<1x1024xi32>
    %8 = arith.cmpi slt, %4, %7 : vector<1x1024xi32>
    %c0_i32_2 = arith.constant 0 : i32
    %9 = arith.cmpi slt, %2, %c0_i32_2 : i32
    %10 = vector.broadcast %9 : i1 to vector<1x1024xi1>
    %11 = vector.broadcast %10 : vector<1x1024xi1> to vector<1x1024xi1>
    %12 = arith.xori %8, %11 : vector<1x1024xi1>
    %13 = arith.andi %12, %6 : vector<1x1024xi1>
    %14 = vector.broadcast %2 : i32 to vector<1x1024xi32>
    %15 = arith.addi %4, %14 : vector<1x1024xi32>
    %16 = arith.select %13, %15, %4 : vector<1x1024xi1>, vector<1x1024xi32>
    %c-1_i32 = arith.constant -1 : i32
    %17 = vector.broadcast %c-1_i32 : i32 to vector<1x1024xi32>
    %18 = arith.addi %16, %17 : vector<1x1024xi32>
    %c0_i32_3 = arith.constant 0 : i32
    %19 = vector.broadcast %c0_i32_3 : i32 to vector<1x1024xi32>
    %20 = arith.cmpi sge, %18, %19 : vector<1x1024xi32>
    %c-1_i32_4 = arith.constant -1 : i32
    %21 = vector.broadcast %c-1_i32_4 : i32 to vector<1x1024xi32>
    %22 = arith.addi %16, %21 : vector<1x1024xi32>
    %c128_i32_5 = arith.constant 128 : i32
    %23 = vector.broadcast %c128_i32_5 : i32 to vector<1x1024xi32>
    %24 = arith.cmpi slt, %22, %23 : vector<1x1024xi32>
    %25 = arith.andi %20, %24 : vector<1x1024xi1>
    %c1_i32_6 = arith.constant 1 : i32
    %26 = vector.broadcast %c1_i32_6 : i32 to vector<1x1024xi32>
    %27 = arith.addi %16, %26 : vector<1x1024xi32>
    %c0_i32_7 = arith.constant 0 : i32
    %28 = vector.broadcast %c0_i32_7 : i32 to vector<1x1024xi32>
    %29 = arith.cmpi sge, %27, %28 : vector<1x1024xi32>
    %c1_i32_8 = arith.constant 1 : i32
    %30 = vector.broadcast %c1_i32_8 : i32 to vector<1x1024xi32>
    %31 = arith.addi %16, %30 : vector<1x1024xi32>
    %c128_i32_9 = arith.constant 128 : i32
    %32 = vector.broadcast %c128_i32_9 : i32 to vector<1x1024xi32>
    %33 = arith.cmpi slt, %31, %32 : vector<1x1024xi32>
    %34 = arith.andi %29, %33 : vector<1x1024xi1>
    %c0 = arith.constant 0 : index
    %c0_10 = arith.constant 0 : index
    %35 = vector.load %arg5[%c0, %c0_10] : memref<16x8xf32, #tpu.memory_space<vmem>>, vector<16x8xf32>
    %36 = vector.extract_strided_slice %35 {offsets = [0, 0], sizes = [16, 1], strides = [1, 1]} : vector<16x8xf32> to vector<16x1xf32>
    %37 = vector.extract_strided_slice %35 {offsets = [0, 1], sizes = [16, 1], strides = [1, 1]} : vector<16x8xf32> to vector<16x1xf32>
    %38 = vector.extract_strided_slice %35 {offsets = [0, 2], sizes = [16, 1], strides = [1, 1]} : vector<16x8xf32> to vector<16x1xf32>
    %39 = vector.extract_strided_slice %35 {offsets = [0, 3], sizes = [16, 1], strides = [1, 1]} : vector<16x8xf32> to vector<16x1xf32>
    %40 = vector.extract_strided_slice %35 {offsets = [0, 4], sizes = [16, 1], strides = [1, 1]} : vector<16x8xf32> to vector<16x1xf32>
    %41 = vector.extract_strided_slice %35 {offsets = [0, 5], sizes = [16, 1], strides = [1, 1]} : vector<16x8xf32> to vector<16x1xf32>
    %42 = vector.extract_strided_slice %35 {offsets = [0, 6], sizes = [16, 1], strides = [1, 1]} : vector<16x8xf32> to vector<16x1xf32>
    %43 = vector.extract_strided_slice %35 {offsets = [0, 7], sizes = [1, 1], strides = [1, 1]} : vector<16x8xf32> to vector<1x1xf32>
    %c0_11 = arith.constant 0 : index
    %c0_12 = arith.constant 0 : index
    %44 = vector.load %arg2[%c0_11, %c0_12] : memref<8x1024xf32, #tpu.memory_space<vmem>>, vector<8x1024xf32>
    %c1_i32_13 = arith.constant 1 : i32
    %45 = tpu.dynamic_rotate %44 by %c1_i32_13 dim 1 : vector<8x1024xf32>, i32 -> vector<8x1024xf32>
    %cst = arith.constant 0.000000e+00 : f32
    %46 = vector.broadcast %cst : f32 to vector<8x1024xf32>
    %47 = vector.shape_cast %25 : vector<1x1024xi1> to vector<1x1024xi1>
    %48 = vector.broadcast %47 : vector<1x1024xi1> to vector<8x1024xi1>
    %49 = arith.select %48, %45, %46 : vector<8x1024xi1>, vector<8x1024xf32>
    %c1023_i32 = arith.constant 1023 : i32
    %50 = tpu.dynamic_rotate %44 by %c1023_i32 dim 1 : vector<8x1024xf32>, i32 -> vector<8x1024xf32>
    %cst_14 = arith.constant 0.000000e+00 : f32
    %51 = vector.broadcast %cst_14 : f32 to vector<8x1024xf32>
    %52 = vector.shape_cast %34 : vector<1x1024xi1> to vector<1x1024xi1>
    %53 = vector.broadcast %52 : vector<1x1024xi1> to vector<8x1024xi1>
    %54 = arith.select %53, %50, %51 : vector<8x1024xi1>, vector<8x1024xf32>
    %55 = tpu.concatenate %49, %44, %54 in 0 : vector<8x1024xf32>, vector<8x1024xf32>, vector<8x1024xf32> -> vector<24x1024xf32>
    %c0_15 = arith.constant 0 : index
    %c0_16 = arith.constant 0 : index
    %56 = vector.load %arg3[%c0_15, %c0_16] : memref<16x24xf32, #tpu.memory_space<vmem>>, vector<16x24xf32>
    %cst_17 = arith.constant dense<0.000000e+00> : vector<16x1024xf32>
    %57 = tpu.matmul %56, %55, %cst_17 {dimension_numbers = #tpu.dot_dimension_numbers<[1], [0], [0], [1], [0, 0, 1, 1], [], []>} : vector<16x24xf32>, vector<24x1024xf32>, vector<16x1024xf32> -> vector<16x1024xf32>
    %58 = vector.broadcast %36 : vector<16x1xf32> to vector<16x1024xf32>
    %59 = arith.addf %57, %58 : vector<16x1024xf32>
    %cst_18 = arith.constant 0.000000e+00 : f32
    %60 = vector.broadcast %cst_18 : f32 to vector<16x1024xf32>
    %61 = arith.maximumf %59, %60 : vector<16x1024xf32>
    %cst_19 = arith.constant dense<0.000000e+00> : vector<1024xf32>
    %62 = vector.multi_reduction <add>, %61, %cst_19 [0] : vector<16x1024xf32> to vector<1024xf32>
    %63 = vector.shape_cast %62 : vector<1024xf32> to vector<1x1024xf32>
    %cst_20 = arith.constant 1.600000e+01 : f32
    %64 = vector.broadcast %cst_20 : f32 to vector<1x1024xf32>
    %65 = arith.divf %63, %64 : vector<1x1024xf32>
    %66 = vector.broadcast %65 : vector<1x1024xf32> to vector<16x1024xf32>
    %67 = arith.subf %61, %66 : vector<16x1024xf32>
    %68 = vector.broadcast %65 : vector<1x1024xf32> to vector<16x1024xf32>
    %69 = arith.subf %61, %68 : vector<16x1024xf32>
    %70 = arith.mulf %67, %69 : vector<16x1024xf32>
    %cst_21 = arith.constant dense<0.000000e+00> : vector<1024xf32>
    %71 = vector.multi_reduction <add>, %70, %cst_21 [0] : vector<16x1024xf32> to vector<1024xf32>
    %72 = vector.shape_cast %71 : vector<1024xf32> to vector<1x1024xf32>
    %cst_22 = arith.constant 1.600000e+01 : f32
    %73 = vector.broadcast %cst_22 : f32 to vector<1x1024xf32>
    %74 = arith.divf %72, %73 : vector<1x1024xf32>
    %75 = vector.broadcast %65 : vector<1x1024xf32> to vector<16x1024xf32>
    %76 = arith.subf %61, %75 : vector<16x1024xf32>
    %cst_23 = arith.constant 9.99999974E-6 : f32
    %77 = vector.broadcast %cst_23 : f32 to vector<1x1024xf32>
    %78 = arith.addf %74, %77 : vector<1x1024xf32>
    %79 = math.rsqrt %78 : vector<1x1024xf32>
    %80 = vector.broadcast %79 : vector<1x1024xf32> to vector<16x1024xf32>
    %81 = arith.mulf %76, %80 : vector<16x1024xf32>
    %82 = vector.broadcast %37 : vector<16x1xf32> to vector<16x1024xf32>
    %83 = arith.mulf %81, %82 : vector<16x1024xf32>
    %84 = vector.broadcast %38 : vector<16x1xf32> to vector<16x1024xf32>
    %85 = arith.addf %83, %84 : vector<16x1024xf32>
    %c1_i32_24 = arith.constant 1 : i32
    %86 = tpu.dynamic_rotate %85 by %c1_i32_24 dim 1 : vector<16x1024xf32>, i32 -> vector<16x1024xf32>
    %cst_25 = arith.constant 0.000000e+00 : f32
    %87 = vector.broadcast %cst_25 : f32 to vector<16x1024xf32>
    %88 = vector.shape_cast %25 : vector<1x1024xi1> to vector<1x1024xi1>
    %89 = vector.broadcast %88 : vector<1x1024xi1> to vector<16x1024xi1>
    %90 = arith.select %89, %86, %87 : vector<16x1024xi1>, vector<16x1024xf32>
    %c1023_i32_26 = arith.constant 1023 : i32
    %91 = tpu.dynamic_rotate %85 by %c1023_i32_26 dim 1 : vector<16x1024xf32>, i32 -> vector<16x1024xf32>
    %cst_27 = arith.constant 0.000000e+00 : f32
    %92 = vector.broadcast %cst_27 : f32 to vector<16x1024xf32>
    %93 = vector.shape_cast %34 : vector<1x1024xi1> to vector<1x1024xi1>
    %94 = vector.broadcast %93 : vector<1x1024xi1> to vector<16x1024xi1>
    %95 = arith.select %94, %91, %92 : vector<16x1024xi1>, vector<16x1024xf32>
    %96 = tpu.concatenate %90, %85, %95 in 0 : vector<16x1024xf32>, vector<16x1024xf32>, vector<16x1024xf32> -> vector<48x1024xf32>
    %c0_28 = arith.constant 0 : index
    %c0_29 = arith.constant 0 : index
    %97 = vector.load %arg4[%c0_28, %c0_29] : memref<16x48xf32, #tpu.memory_space<vmem>>, vector<16x48xf32>
    %cst_30 = arith.constant dense<0.000000e+00> : vector<16x1024xf32>
    %98 = tpu.matmul %97, %96, %cst_30 {dimension_numbers = #tpu.dot_dimension_numbers<[1], [0], [0], [1], [0, 0, 1, 1], [], []>} : vector<16x48xf32>, vector<48x1024xf32>, vector<16x1024xf32> -> vector<16x1024xf32>
    %99 = vector.broadcast %39 : vector<16x1xf32> to vector<16x1024xf32>
    %100 = arith.addf %98, %99 : vector<16x1024xf32>
    %cst_31 = arith.constant 0.000000e+00 : f32
    %101 = vector.broadcast %cst_31 : f32 to vector<16x1024xf32>
    %102 = arith.maximumf %100, %101 : vector<16x1024xf32>
    %cst_32 = arith.constant dense<0.000000e+00> : vector<1024xf32>
    %103 = vector.multi_reduction <add>, %102, %cst_32 [0] : vector<16x1024xf32> to vector<1024xf32>
    %104 = vector.shape_cast %103 : vector<1024xf32> to vector<1x1024xf32>
    %cst_33 = arith.constant 1.600000e+01 : f32
    %105 = vector.broadcast %cst_33 : f32 to vector<1x1024xf32>
    %106 = arith.divf %104, %105 : vector<1x1024xf32>
    %107 = vector.broadcast %106 : vector<1x1024xf32> to vector<16x1024xf32>
    %108 = arith.subf %102, %107 : vector<16x1024xf32>
    %109 = vector.broadcast %106 : vector<1x1024xf32> to vector<16x1024xf32>
    %110 = arith.subf %102, %109 : vector<16x1024xf32>
    %111 = arith.mulf %108, %110 : vector<16x1024xf32>
    %cst_34 = arith.constant dense<0.000000e+00> : vector<1024xf32>
    %112 = vector.multi_reduction <add>, %111, %cst_34 [0] : vector<16x1024xf32> to vector<1024xf32>
    %113 = vector.shape_cast %112 : vector<1024xf32> to vector<1x1024xf32>
    %cst_35 = arith.constant 1.600000e+01 : f32
    %114 = vector.broadcast %cst_35 : f32 to vector<1x1024xf32>
    %115 = arith.divf %113, %114 : vector<1x1024xf32>
    %116 = vector.broadcast %106 : vector<1x1024xf32> to vector<16x1024xf32>
    %117 = arith.subf %102, %116 : vector<16x1024xf32>
    %cst_36 = arith.constant 9.99999974E-6 : f32
    %118 = vector.broadcast %cst_36 : f32 to vector<1x1024xf32>
    %119 = arith.addf %115, %118 : vector<1x1024xf32>
    %120 = math.rsqrt %119 : vector<1x1024xf32>
    %121 = vector.broadcast %120 : vector<1x1024xf32> to vector<16x1024xf32>
    %122 = arith.mulf %117, %121 : vector<16x1024xf32>
    %123 = vector.broadcast %40 : vector<16x1xf32> to vector<16x1024xf32>
    %124 = arith.mulf %122, %123 : vector<16x1024xf32>
    %125 = vector.broadcast %41 : vector<16x1xf32> to vector<16x1024xf32>
    %126 = arith.addf %124, %125 : vector<16x1024xf32>
    %127 = vector.broadcast %42 : vector<16x1xf32> to vector<16x1024xf32>
    %128 = arith.mulf %127, %126 : vector<16x1024xf32>
    %cst_37 = arith.constant dense<0.000000e+00> : vector<1024xf32>
    %129 = vector.multi_reduction <add>, %128, %cst_37 [0] : vector<16x1024xf32> to vector<1024xf32>
    %130 = vector.shape_cast %129 : vector<1024xf32> to vector<1x1024xf32>
    %131 = vector.broadcast %43 : vector<1x1xf32> to vector<1x1024xf32>
    %132 = arith.addf %130, %131 : vector<1x1024xf32>
    %133 = vector.shape_cast %132 : vector<1x1024xf32> to vector<8x128xf32>
    %134 = tpu.iota {dimensions = array<i32: 1>} : vector<8x128xi32>
    %135 = tpu.iota {dimensions = array<i32: 0>} : vector<8x128xi32>
    %c8_i32 = arith.constant 8 : i32
    %136 = arith.muli %arg0, %c8_i32 : i32
    %c0_i32_38 = arith.constant 0 : i32
    %137 = vector.broadcast %c0_i32_38 : i32 to vector<8x128xi32>
    %c0_i32_39 = arith.constant 0 : i32
    %138 = vector.broadcast %c0_i32_39 : i32 to vector<8x128xi32>
    %139 = arith.cmpi eq, %135, %138 : vector<8x128xi32>
    %c0_i32_40 = arith.constant 0 : i32
    %140 = arith.addi %136, %c0_i32_40 : i32
    %141 = arith.index_cast %140 : i32 to index
    %142 = memref.load %arg1[%141] : memref<16xi32, #tpu.memory_space<smem>>
    %143 = vector.broadcast %142 : i32 to vector<8x128xi32>
    %144 = arith.select %139, %143, %137 : vector<8x128xi1>, vector<8x128xi32>
    %c1_i32_41 = arith.constant 1 : i32
    %145 = vector.broadcast %c1_i32_41 : i32 to vector<8x128xi32>
    %146 = arith.cmpi eq, %135, %145 : vector<8x128xi32>
    %c1_i32_42 = arith.constant 1 : i32
    %147 = arith.addi %136, %c1_i32_42 : i32
    %148 = arith.index_cast %147 : i32 to index
    %149 = memref.load %arg1[%148] : memref<16xi32, #tpu.memory_space<smem>>
    %150 = vector.broadcast %149 : i32 to vector<8x128xi32>
    %151 = arith.select %146, %150, %144 : vector<8x128xi1>, vector<8x128xi32>
    %c2_i32 = arith.constant 2 : i32
    %152 = vector.broadcast %c2_i32 : i32 to vector<8x128xi32>
    %153 = arith.cmpi eq, %135, %152 : vector<8x128xi32>
    %c2_i32_43 = arith.constant 2 : i32
    %154 = arith.addi %136, %c2_i32_43 : i32
    %155 = arith.index_cast %154 : i32 to index
    %156 = memref.load %arg1[%155] : memref<16xi32, #tpu.memory_space<smem>>
    %157 = vector.broadcast %156 : i32 to vector<8x128xi32>
    %158 = arith.select %153, %157, %151 : vector<8x128xi1>, vector<8x128xi32>
    %c3_i32 = arith.constant 3 : i32
    %159 = vector.broadcast %c3_i32 : i32 to vector<8x128xi32>
    %160 = arith.cmpi eq, %135, %159 : vector<8x128xi32>
    %c3_i32_44 = arith.constant 3 : i32
    %161 = arith.addi %136, %c3_i32_44 : i32
    %162 = arith.index_cast %161 : i32 to index
    %163 = memref.load %arg1[%162] : memref<16xi32, #tpu.memory_space<smem>>
    %164 = vector.broadcast %163 : i32 to vector<8x128xi32>
    %165 = arith.select %160, %164, %158 : vector<8x128xi1>, vector<8x128xi32>
    %c4_i32 = arith.constant 4 : i32
    %166 = vector.broadcast %c4_i32 : i32 to vector<8x128xi32>
    %167 = arith.cmpi eq, %135, %166 : vector<8x128xi32>
    %c4_i32_45 = arith.constant 4 : i32
    %168 = arith.addi %136, %c4_i32_45 : i32
    %169 = arith.index_cast %168 : i32 to index
    %170 = memref.load %arg1[%169] : memref<16xi32, #tpu.memory_space<smem>>
    %171 = vector.broadcast %170 : i32 to vector<8x128xi32>
    %172 = arith.select %167, %171, %165 : vector<8x128xi1>, vector<8x128xi32>
    %c5_i32 = arith.constant 5 : i32
    %173 = vector.broadcast %c5_i32 : i32 to vector<8x128xi32>
    %174 = arith.cmpi eq, %135, %173 : vector<8x128xi32>
    %c5_i32_46 = arith.constant 5 : i32
    %175 = arith.addi %136, %c5_i32_46 : i32
    %176 = arith.index_cast %175 : i32 to index
    %177 = memref.load %arg1[%176] : memref<16xi32, #tpu.memory_space<smem>>
    %178 = vector.broadcast %177 : i32 to vector<8x128xi32>
    %179 = arith.select %174, %178, %172 : vector<8x128xi1>, vector<8x128xi32>
    %c6_i32 = arith.constant 6 : i32
    %180 = vector.broadcast %c6_i32 : i32 to vector<8x128xi32>
    %181 = arith.cmpi eq, %135, %180 : vector<8x128xi32>
    %c6_i32_47 = arith.constant 6 : i32
    %182 = arith.addi %136, %c6_i32_47 : i32
    %183 = arith.index_cast %182 : i32 to index
    %184 = memref.load %arg1[%183] : memref<16xi32, #tpu.memory_space<smem>>
    %185 = vector.broadcast %184 : i32 to vector<8x128xi32>
    %186 = arith.select %181, %185, %179 : vector<8x128xi1>, vector<8x128xi32>
    %c7_i32 = arith.constant 7 : i32
    %187 = vector.broadcast %c7_i32 : i32 to vector<8x128xi32>
    %188 = arith.cmpi eq, %135, %187 : vector<8x128xi32>
    %c7_i32_48 = arith.constant 7 : i32
    %189 = arith.addi %136, %c7_i32_48 : i32
    %190 = arith.index_cast %189 : i32 to index
    %191 = memref.load %arg1[%190] : memref<16xi32, #tpu.memory_space<smem>>
    %192 = vector.broadcast %191 : i32 to vector<8x128xi32>
    %193 = arith.select %188, %192, %186 : vector<8x128xi1>, vector<8x128xi32>
    %194 = arith.cmpi sge, %134, %193 : vector<8x128xi32>
    %cst_49 = arith.constant 0.000000e+00 : f32
    %195 = vector.broadcast %cst_49 : f32 to vector<8x128xf32>
    %196 = arith.select %194, %195, %133 : vector<8x128xi1>, vector<8x128xf32>
    %c0_50 = arith.constant 0 : index
    %c0_51 = arith.constant 0 : index
    %197 = vector.load %arg6[%c0_50, %c0_51] : memref<8x128xf32, #tpu.memory_space<vmem>>, vector<8x128xf32>
    tpu.vector_store %arg6[%c0_50, %c0_51], %196 {strides = array<i32>} : memref<8x128xf32, #tpu.memory_space<vmem>>, vector<8x128xf32>,
    return
  }
  func.func @transform_0(%arg0: i32, %arg1: memref<16xi32, #tpu.memory_space<smem>>) -> (i32, i32) {
    %c0_i32 = arith.constant 0 : i32
    %c0_i32_0 = arith.constant 0 : i32
    return %c0_i32, %arg0 : i32, i32
  }
  func.func @transform_1(%arg0: i32, %arg1: memref<16xi32, #tpu.memory_space<smem>>) -> (i32, i32) {
    %c0_i32 = arith.constant 0 : i32
    %c0_i32_0 = arith.constant 0 : i32
    %c0_i32_1 = arith.constant 0 : i32
    return %c0_i32, %c0_i32_0 : i32, i32
  }
  func.func @transform_2(%arg0: i32, %arg1: memref<16xi32, #tpu.memory_space<smem>>) -> (i32, i32) {
    %c0_i32 = arith.constant 0 : i32
    %c0_i32_0 = arith.constant 0 : i32
    %c0_i32_1 = arith.constant 0 : i32
    return %c0_i32, %c0_i32_0 : i32, i32
  }
  func.func @transform_3(%arg0: i32, %arg1: memref<16xi32, #tpu.memory_space<smem>>) -> (i32, i32) {
    %c0_i32 = arith.constant 0 : i32
    %c0_i32_0 = arith.constant 0 : i32
    %c0_i32_1 = arith.constant 0 : i32
    return %c0_i32, %c0_i32_0 : i32, i32
  }
  func.func @transform_4(%arg0: i32, %arg1: memref<16xi32, #tpu.memory_space<smem>>) -> (i32, i32) {
    %c0_i32 = arith.constant 0 : i32
    %c0_i32_0 = arith.constant 0 : i32
    return %arg0, %c0_i32 : i32, i32
  }
}

</mosaic_0001>

<bundles_post_ra>
// kernel: tpu_custom_call.1
= control target key start
LH: loop header
LB: loop body
LE: loop exit
PB: predicated region body
PF: predicated region fallthrough
CT: control target
= control target key end

     0   :  { %s3715_s0 = inlined_call_operand.vmem [shape: s32[16], index: 0, kind: input, shape index: {}]   ;;  %s3716_s1 = inlined_call_operand.hbm [shape: f32[8,2048], index: 1, kind: input, shape index: {}]   ;;  %s3717_s2 = inlined_call_operand.vmem [shape: f32[16,24], index: 2, kind: input, shape index: {}]   ;;  %s3718_s3 = inlined_call_operand.hbm [shape: f32[16,48], index: 3, kind: input, shape index: {}]   ;;  %s3719_s4 = inlined_call_operand.vmem [shape: f32[16,8], index: 4, kind: input, shape index: {}]   ;;  %s3720_s5 = inlined_call_operand.hbm [shape: f32[16,128], index: 5, kind: output, shape index: {}]  }
   0x1   :  { %s10_s20 = sshll.u32 %s3715_s0, 4  ;;  %s11_s20 = int_to_ptr.vmem [resolvable:$true] %s10_s20 }
   0x2   :  { %s2295_s21 = scalar_lea.vmem %s11_s20, 16  ;;  %p2300_p1 = scmp.lt.s32.totalorder %s11_s20, %s11_s20 }
   0x3   :  { %p2296_p0 = scmp.ne.s32.totalorder %s11_s20, %s2295_s21  ;;  %p2301_p2 = scmp.lt.s32.totalorder %s2295_s21, %s2295_s21 }
   0x5   :  { %p2302_p3 = por %p2301_p2, %p2300_p1 }
   0x7   :  { %p2303_p4 = pnand %p2302_p3, %p2296_p0 }
   0x9   :  { %2306 = shalt.err (!%p2303_p4)  }
   0xa   :  { %s2433_s22 = smov [#allocation3]  }
   0xb   :  { %13 = dma.vmem_to_smem %s11_s20, 16, %s2433_s22, [#allocation2] }
   0xc   :  { %2403 = dma.done.wait [#allocation2], 16 }
   0xd   :  { %2404 = vsyncadd [#allocation2], 4294967280 }
   0xe   :  { %15 = sfence }
   0xf   :  { %16 = vsyncpa [#allocation5], 0 }
  0x10   :  { %18 = vsyncpa [#allocation5 + $0x1], 0 }
  0x11   :  { %19 = vsyncpa [#allocation8], 0 }
  0x12   :  { %20 = vsyncpa [#allocation6], 0 }
  0x13   :  { %22 = vsyncpa [#allocation6 + $0x1], 0  ;;  %s2484_s23 = smov 0   ;;  %s2486_s0 = smov 0  }
  0x14   :  { %s2488_s24 = smov 0   ;;  %s2490_s25 = smov 0  }
  0x15 LB: > { %s2505_s26 = sadd.s32 4294967295, %s2431_s25   ;;  %s2096_s27 = sadd.s32 4294967294, %s2431_s25   ;;  %s2431_s25 = sphi %s2490_s25, %s3782_s25   ;;  %s2427_s24 = sphi %s2488_s24, %s3781_s24   ;;  %s2423_s0 = sphi %s2486_s0, %s3780_s0   ;;  %s2419_s23 = sphi %s2484_s23, %s3779_s23  }
  0x16   : > { %p48_p5 = scmp.ne.s32.totalorder %s2423_s0, %s2419_s23  ;;  %p3721_p6 = scmp.eq.s32.totalorder %s2505_s26, 0 }
  0x17   : > { %p141_p8 = scmp.eq.s32.totalorder %s2096_s27, 1  ;;  %p2097_p10 = scmp.ge.s32.totalorder %s2431_s25, 1 }
  0x18   : > { %p2514_p9 = por %p3721_p6, %p48_p5  ;;  %p148_p12 = scmp.lt.s32.totalorder %s2431_s25, 3 }
  0x19   : > { %p2519_p11 = por %p141_p8, %p48_p5  ;;  %s2434_s6 = smov [#allocation7]  }
  0x1a   : > { %s3744_s28 = scalar_select %p2514_p9, 1, 0 }
  0x1b   : > { %s3745_s29 = scalar_select %p2519_p11, 1, 0 }
  0x1c   : > { %p2524_p13 = pnand %p2097_p10, %p148_p12  ;;  %s163_s7 = sshll.u32 %s2434_s6, 4  ;;  %s164_s7 = int_to_ptr.vmem [resolvable:$true] %s163_s7 }
  0x1d   : > { %s2538_s9 = sadd.s32 1, %s2431_s25   ;;  %s35_s10 = sadd.s32 1, %s2427_s24 }
  0x1e   : > { %s3746_s30 = scalar_select %p2524_p13, 1, 0 }
  0x1f   : > { %p2185_p0 = pneg %p2524_p13  ;;  %s32_s11 = ssub.s32 %s2431_s25, %s2538_s9 }
  0x20   : > { %s2318_s12 = scalar_lea.vmem %s164_s7, 256  ;;  %p2326_p10 = scmp.lt.s32.totalorder %s164_s7, %s164_s7 }
  0x21   : > { %p2533_p2 = pnand %p2185_p0, %p3721_p6  ;;  %p2319_p4 = scmp.ne.s32.totalorder %s164_s7, %s2318_s12 }
  0x22   : > { %p2327_p12 = scmp.lt.s32.totalorder %s2318_s12, %s2318_s12 }
  0x23   : > { %p2309_p3 = pneg %p2533_p2 }
  0x24   : > { %p2328_p1 = por %p2327_p12, %p2326_p10 }
  0x25   : > { %p2321_p5 = pnand %p2319_p4, %p2309_p3 }
  0x27   : > { %p2322_p8 = pneg %p2321_p5 }
  0x29   : > { %p2329_p7 = pnand %p2328_p1, %p2322_p8 }
  0x2b   : > { %2332 = shalt.err (!%p2329_p7)
}
  0x2c   : > { %s2435_s13 = smov 128   ;;  %s2436_s14 = smov 8  }
  0x2d   : > { %2188 = dma.hbm_to_vmem [thread:$0]  (!%p2533_p2), %s3718_s3, 256, %s164_s7, [#allocation8], %s2435_s13, %s2435_s13, %s2436_s14  }
  0x2e   : > { %p33_p0 = scmp.eq.s32.totalorder %s32_s11, 0  ;;  %p42_p3 = scmp.ne.s32.totalorder %s2427_s24, %s2423_s0 }
  0x2f   : > { %p43_p1 = scmp.eq.s32.totalorder %s2431_s25, 0  ;;  %p2198_p7 = scmp.lt.s32.totalorder %s2431_s25, 2 }
  0x30   : > { %s2555_s17 = scalar_select %p33_p0, %s2427_s24, %s35_s10  }
  0x31   : > { %p44_p4 = por %p43_p1, %p42_p3  ;;  %p3748_p5 = scmp.eq.s32.totalorder %s2505_s26, 1 }
  0x32   : > { %s180_s19 = sand.u32 1, %s2427_s24   ;;  %s2176_s20 = sshll.u32 %s2431_s25, 10 }
  0x33   : > { %p2559_p8 = por %p3748_p5, %p42_p3  ;;  %s2100_s21 = sshll.u32 %s180_s19, 6 }
  0x34   : > { %s2568_s6 = scalar_lea.hbm %s3716_s1, %s2176_s20  ;;  %s184_s7 = scalar_lea.vmem [#allocation4], %s2100_s21 }
  0x35   : > { %s3749_s18 = scalar_select %p2559_p8, 1, 0 }
  0x36   : > { %s192_s8 = sshll.u32 %s184_s7, 4  ;;  %p2570_p2 = pnand %p2198_p7, %p44_p4  ;;  %s193_s8 = int_to_ptr.vmem [resolvable:$true] %s192_s8 }
  0x37   : > { %s181_s11 = scalar_lea.sflag [#allocation5], %s180_s19  ;;  %s2333_s12 = scalar_lea.hbm %s2568_s6, 1024 }
  0x38   : > { %p2334_p10 = scmp.ne.s32.totalorder %s2568_s6, %s2333_s12  ;;  %p2335_p12 = pneg %p2570_p2 }
  0x39   : > { %s2338_s15 = scalar_lea.hbm %s3716_s1, 2048  ;;  %p2339_p1 = scmp.lt.s32.totalorder %s2568_s6, %s3716_s1 }
  0x3a   : > { %p2336_p0 = pnand %p2335_p12, %p2334_p10  ;;  %p2340_p7 = scmp.lt.s32.totalorder %s2338_s15, %s2333_s12 }
  0x3c   : > { %p2337_p3 = pneg %p2336_p0  ;;  %p2341_p4 = por %p2340_p7, %p2339_p1 }
  0x3e   : > { %p2342_p5 = pnand %p2341_p4, %p2337_p3 }
  0x40   : > { %2345 = shalt.err (!%p2342_p5)
}
  0x41   : > { %s2346_s21 = scalar_lea.vmem %s193_s8, 1024  ;;  %s2437_s19 = smov [#allocation4]  }
  0x42   : > { %p2347_p6 = scmp.ne.s32.totalorder %s193_s8, %s2346_s21  ;;  %s2351_s22 = sshll.u32 %s2437_s19, 4  ;;  %s2352_s22 = int_to_ptr.vmem [resolvable:$false] %s2351_s22 }
  0x43   : > { %s2353_s27 = scalar_lea.vmem %s2352_s22, 2048  ;;  %p2354_p10 = scmp.lt.s32.totalorder %s193_s8, %s2352_s22 }
  0x44   : > { %p2349_p11 = pnand %p2347_p6, %p2335_p12  ;;  %p2355_p0 = scmp.lt.s32.totalorder %s2353_s27, %s2346_s21 }
  0x46   : > { %p2350_p8 = pneg %p2349_p11  ;;  %p2356_p9 = por %p2355_p0, %p2354_p10 }
  0x48   : > { %p2357_p13 = pnand %p2356_p9, %p2350_p8 }
  0x4a   : > { %2360 = shalt.err (!%p2357_p13)
}
  0x4b   : > { %2192 = dma.hbm_to_vmem [thread:$0]  (!%p2570_p2), %s2568_s6, 1024, %s193_s8, %s181_s11  }
  0x4c   : > { %p3751_p3 = scmp.ne.s32.totalorder %s3746_s30, 0 }
  0x4e   : > { %201 = sbr.rel (%p3751_p3) target bundleno = 981 (0x3d5), region = 36 }
  0x53   : > { %s2591_s7 = sand.u32 1, %s2423_s0   ;;  %p3752_p6 = scmp.ne.s32.totalorder %s3744_s28, 0 }
  0x54   : > { %s2104_s12 = sshll.u32 %s2591_s7, 6  ;;  %s204_s13 = scalar_lea.sflag [#allocation5], %s2591_s7 }
  0x55   : > { %s207_s14 = scalar_lea.vmem [#allocation4], %s2104_s12 }
  0x56   : > { %2406 = dma.done.wait (%p3752_p6), %s204_s13, 1024  }
  0x57   : > { %2408 = vsyncadd (%p3752_p6), %s204_s13, 4294966272  ;;  %p3753_p9 = scmp.eq.s32.totalorder %s2505_s26, 0 }
  0x59   : > { %2410 = dma.done.wait (%p3753_p9), [#allocation8], 256   ;;  %p3754_p11 = pmov %p3753_p9 }
  0x5a   : > { %v3729_v0 = vmov 0.0   ;;  %v2605_v1 = vld [vmem:[%s207_s14 + $0x8] sm:$0xff]  ;;  %v2607_v2 = vld [vmem:[%s207_s14] sm:$0xff]  ;;  %s2439_s30 = smov 127   ;;  %v2613_v3 = vld [vmem:[%s207_s14 + $0x10] sm:$0xff]  ;;  %s2440_s28 = smov 1   ;;  %v3728_v14 = vlaneseq }
  0x5b   : > { %2412 = vsyncadd (%p3754_p11), [#allocation8], 4294967040  ;;  %597 = vmatprep.mubr.f32.mxu0 %v3729_v0  ;;  %674 = vmatprep.mubr.f32.mxu1 %v3729_v0  ;;  %v2619_v4 = vld [vmem:[%s207_s14 + $0x38] sm:$0xff]  ;;  %v2627_v6 = vld [vmem:[%s207_s14 + $0x20] sm:$0xff]  ;;  %v2441_v9 = vmov 0   ;;  %v2442_v12 = vmov 1  }
  0x5c   : > { %467 = vrot.lane.b32.xlu0 %v2605_v1, %s2439_s30  ;;  %465 = vrot.lane.b32.xlu1 %v2607_v2, %s2439_s30  ;;  %v2625_v5 = vld [vmem:[%s207_s14 + $0x18] sm:$0xff]  ;;  %v2633_v7 = vld [vmem:[%s207_s14 + $0x28] sm:$0xff]  ;;  %v2443_v13 = vmov 2   ;;  %v2670_v15 = vand.u32 127, %v3728_v14  ;;  %vm526_vm6 = vcmask 195584   ;;  %s3560_s19 = sshll.u32 %s2505_s26, 3 }
  0x5d   : > { %v2635_v8 = vld [vmem:[%s207_s14 + $0x30] sm:$0xff]  ;;  %2250 = vset.pattern.permute.xlu1 %v2441_v9  ;;  %2249 = vset.pattern.permute.xlu0 %v2441_v9  ;;  %v2656_v10 = vld [vmem:[%s3719_s4 + $0x8] sm:$0xff]  ;;  %v2661_v11 = vld [vmem:[%s3719_s4] sm:$0xff]  ;;  %s3569_s22 = sld [smem:[#allocation3 + %s3560_s19]]  ;;  %s1965_s27 = sadd.s32 1, %s3560_s19 }
  0x5e   : > { %v239_v16 = vadd.s32 128, %v2670_v15  ;;  %v241_v19 = vadd.s32 384, %v2670_v15  ;;  %v2679_v22 = vadd.s32 1, %v2670_v15  ;;  %v240_v23 = vadd.s32 256, %v2670_v15  ;;  %v2720_v42 = vld [vmem:[%s3717_s2] sm:$0xff]  ;;  %v2742_v49 = vld [vmem:[%s3717_s2 + $0x8] sm:$0xff] }
  0x5f   : > { %vm481_vm0 = vcmp.lt.s32.totalorder %v2670_v15, 127  ;;  %v243_v26 = vadd.s32 640, %v2670_v15  ;;  %v2689_v29 = vadd.s32 4294967295, %v2670_v15  ;;  %v242_v31 = vadd.s32 512, %v2670_v15  ;;  %s3587_s12 = sld [smem:[#allocation3 + %s1965_s27]]  ;;  %s1970_s13 = sadd.s32 2, %s3560_s19 }
  0x60   : > { %469 = vrot.lane.b32.xlu0 %v2613_v3, %s2439_s30  ;;  %416 = vrot.lane.b32.xlu1 %v2607_v2, %s2440_s28  ;;  %v257_v17 = vand.u32 127, %v239_v16  ;;  %v271_v25 = vand.u32 127, %v241_v19  ;;  %vm390_vm2 = vcmp.lt.s32.totalorder %v2679_v22, 128  ;;  %v264_v30 = vand.u32 127, %v240_v23  ;;  %s3624_s14 = sld [smem:[#allocation3 + %s1970_s13]]  ;;  %s1980_s6 = sadd.s32 4, %s3560_s19 }
  0x61   : > { %vm432_vm3 = vcmp.lt.s32.totalorder %v2670_v15, 1  ;;  %v285_v35 = vand.u32 127, %v243_v26  ;;  %vm350_vm5 = vcmp.ge.s32.totalorder %v2689_v29, 0  ;;  %v278_v39 = vand.u32 127, %v242_v31  ;;  %s3648_s8 = sld [smem:[#allocation3 + %s1980_s6]]  ;;  %s1985_s10 = sadd.s32 5, %s3560_s19 }
  0x62   : > { %v2673_v18 = vadd.s32 1, %v257_v17  ;;  %v2684_v24 = vadd.s32 4294967295, %v257_v17  ;;  %v2703_v34 = vadd.s32 1, %v271_v25  ;;  %v2709_v38 = vadd.s32 1, %v264_v30  ;;  %s3655_s11 = sld [smem:[#allocation3 + %s1985_s10]]  ;;  %s1990_s15 = sadd.s32 6, %s3560_s19 }
  0x63   : > { %v2727_v43 = vadd.s32 1, %v285_v35  ;;  %v2732_v46 = vadd.s32 1, %v278_v39  ;;  %v2749_v50 = vadd.s32 4294967295, %v271_v25  ;;  %v245_v51 = vadd.s32 896, %v2670_v15  ;;  %s3662_s16 = sld [smem:[#allocation3 + %s1990_s15]]  ;;  %s1995_s20 = sadd.s32 7, %s3560_s19 }
  0x64   : > { %418 = vrot.lane.b32.xlu0 %v2605_v1, %s2440_s28  ;;  %430 = vrot.lane.b32.xlu1 %v2619_v4, %s2440_s28  ;;  %vm391_vm1 = vcmp.lt.s32.totalorder %v2673_v18, 128  ;;  %vm351_vm4 = vcmp.ge.s32.totalorder %v2684_v24, 0  ;;  %vm393_vm7 = vcmp.lt.s32.totalorder %v2703_v34, 128  ;;  %vm392_vm8 = vcmp.lt.s32.totalorder %v2709_v38, 128  ;;  %s1996_s21 = sld [smem:[#allocation3 + %s1995_s20]]  ;;  %p3776_p8 = scmp.ne.s32.totalorder %s3749_s18, 0 }
  0x65   : > { %vm395_vm9 = vcmp.lt.s32.totalorder %v2727_v43, 128  ;;  %vm3725_vm10 = vcmp.lt.s32.totalorder %v2732_v46, 128  ;;  %v2756_v54 = vadd.s32 4294967295, %v264_v30  ;;  %v244_v55 = vadd.s32 768, %v2670_v15 }
  0x66   : > { %vm353_vm11 = vcmp.ge.s32.totalorder %v2749_v50, 0  ;;  %v2770_v58 = vadd.s32 4294967295, %v285_v35  ;;  %v299_v59 = vand.u32 127, %v245_v51  ;;  %v2774_v62 = vadd.s32 4294967295, %v278_v39 }
  0x67   : > { %vm352_vm12 = vcmp.ge.s32.totalorder %v2756_v54, 0  ;;  %v292_v63 = vand.u32 127, %v244_v55  ;;  %v3766_v29 = vmov 0.0   ;;  %v1227_v54 = vld [vmem:[#allocation7 + $0x8] sm:$0xff] }
  0x68   : > { %471 = vrot.lane.b32.xlu0 %v2625_v5, %s2439_s30  ;;  %473 = vrot.lane.b32.xlu1 %v2627_v6, %s2439_s30  ;;  %vm3727_vm13 = vcmp.ge.s32.totalorder %v2770_v58, 0  ;;  %vm3726_vm14 = vcmp.ge.s32.totalorder %v2774_v62, 0 }
  0x69   : > { %v2791_v9 = vadd.s32 1, %v292_v63  ;;  %v2810_v17 = vadd.s32 4294967295, %v292_v63 }
  0x6b   : > { %3756 = vst [vmem:[#allocation15_spill] sm:$0xff] %v2810_v17 }
  0x6c   : > { %475 = vrot.lane.b32.xlu0 %v2633_v7, %s2439_s30  ;;  %477 = vrot.lane.b32.xlu1 %v2635_v8, %s2439_s30 }
  0x70   : > { %420 = vrot.lane.b32.xlu0 %v2613_v3, %s2440_s28  ;;  %422 = vrot.lane.b32.xlu1 %v2625_v5, %s2440_s28 }
  0x74   : > { %424 = vrot.lane.b32.xlu0 %v2627_v6, %s2440_s28  ;;  %426 = vrot.lane.b32.xlu1 %v2633_v7, %s2440_s28 }
  0x78   : > { %479 = vrot.lane.b32.xlu0 %v2619_v4, %s2439_s30  ;;  %428 = vrot.lane.b32.xlu1 %v2635_v8, %s2440_s28 }
  0x7c   : > { %523 = vperm.xlu1 %2250, %v2656_v10   ;;  %518 = vperm.xlu0 %2249, %v2661_v11  }
  0x80   : > { %2251 = vset.pattern.permute.xlu1 %v2442_v12  ;;  %2252 = vset.pattern.permute.xlu0 %v2442_v12 }
  0x81   : > { %1055 = vperm.xlu1 %2251, %v2656_v10   ;;  %1051 = vperm.xlu0 %2252, %v2661_v11  }
  0x85   : > { %2253 = vset.pattern.permute.xlu1 %v2443_v13  ;;  %v2803_v13 = vadd.s32 4294967295, %v299_v59 }
  0x86   : > { %1079 = vperm.xlu1 %2253, %v2656_v10  }
  0x87   : > { %3755 = vst [vmem:[#allocation14_spill] sm:$0xff] %v2803_v13 }
  0x8a   : > { %1075 = vperm.xlu1 %2253, %v2661_v11  }
  0xce   : > { %v468_v20 = vpop.permute.xlu0 %467  ;;  %v2676_v21 = vpop.permute.xlu1 %465 }
  0xcf   : > { %v488_v33 = vsel %vm481_vm0, %v2676_v21, %v468_v20 }
  0xd2   : > { %v470_v27 = vpop.permute.xlu0 %469  ;;  %v417_v28 = vpop.permute.xlu1 %416 }
  0xd3   : > { %v487_v32 = vsel %vm481_vm0, %v468_v20, %v470_v27 }
  0xd4   : > { %2107 = vmatprep.subr.msk.mxu0 %vm391_vm1, %v487_v32 }
  0xd5   : > { %2108 = vmatpush1.msk.msra.mxu0 %vm390_vm2, %v488_v33 }
  0xd6   : > { %v419_v36 = vpop.permute.xlu0 %418  ;;  %561 = vmatprep.subr.mxu0 %v2605_v1  ;;  %v2706_v37 = vpop.permute.xlu1 %430 }
  0xd7   : > { %v439_v40 = vsel %vm432_vm3, %v417_v28, %v419_v36  ;;  %v440_v41 = vsel %vm432_vm3, %v2706_v37, %v417_v28  ;;  %562 = vmatpush1.msra.mxu0 %v2607_v2 }
  0xd8   : > { %2109 = vmatprep.subr.msk.mxu0 %vm351_vm4, %v439_v40 }
  0xd9   : > { %2110 = vmatpush1.msk.msra.mxu0 %vm350_vm5, %v440_v41 }
  0xda   : > { %v472_v44 = vpop.permute.xlu0 %471  ;;  %2111 = vmatmul.mubr.msk.f32.vlgmr.msra.gmra.mxu0 %vm526_vm6, %v2720_v42  ;;  %v474_v45 = vpop.permute.xlu1 %473 }
  0xdb   : > { %v485_v47 = vsel %vm481_vm0, %v472_v44, %v474_v45  ;;  %603 = vmatprep.mubr.f32.mxu0 %v3729_v0  ;;  %v486_v48 = vsel %vm481_vm0, %v470_v27, %v472_v44 }
  0xdc   : > { %2113 = vmatprep.subr.msk.mxu1 %vm393_vm7, %v485_v47 }
  0xdd   : > { %2114 = vmatpush1.msk.msra.mxu1 %vm392_vm8, %v486_v48 }
  0xde   : > { %v476_v52 = vpop.permute.xlu0 %475  ;;  %2112 = vmatmul.mubr.msk.f32.gmra.mxu0 %vm526_vm6, %v2742_v49  ;;  %v478_v53 = vpop.permute.xlu1 %477  ;;  %638 = vmatprep.subr.mxu1 %v2625_v5 }
  0xdf   : > { %v484_v56 = vsel %vm481_vm0, %v474_v45, %v476_v52  ;;  %v483_v57 = vsel %vm481_vm0, %v476_v52, %v478_v53  ;;  %639 = vmatpush1.msra.mxu1 %v2613_v3  ;;  %751 = vmatprep.mubr.f32.mxu0 %v3729_v0  ;;  %v2786_v3 = vadd.s32 1, %v299_v59 }
  0xe0   : > { %2119 = vmatprep.subr.msk.mxu0 %vm395_vm9, %v483_v57 }
  0xe1   : > { %2120 = vmatpush1.msk.msra.mxu0 %vm3725_vm10, %v484_v56  ;;  %vm397_vm15 = vcmp.lt.s32.totalorder %v2786_v3, 128  ;;  %vm396_vm10 = vcmp.lt.s32.totalorder %v2791_v9, 128 }
  0xe2   : > { %v421_v60 = vpop.permute.xlu0 %420  ;;  %v423_v61 = vpop.permute.xlu1 %422  ;;  %715 = vmatprep.subr.mxu0 %v2633_v7 }
  0xe3   : > { %v438_v1 = vsel %vm432_vm3, %v419_v36, %v421_v60  ;;  %v437_v2 = vsel %vm432_vm3, %v421_v60, %v423_v61  ;;  %716 = vmatpush1.msra.mxu0 %v2627_v6 }
  0xe4   : > { %2115 = vmatprep.subr.msk.mxu1 %vm353_vm11, %v437_v2 }
  0xe5   : > { %2116 = vmatpush1.msk.msra.mxu1 %vm352_vm12, %v438_v1 }
  0xe6   : > { %v425_v5 = vpop.permute.xlu0 %424  ;;  %2117 = vmatmul.mubr.msk.f32.vlgmr.msra.gmra.mxu1 %vm526_vm6, %v2720_v42  ;;  %v427_v7 = vpop.permute.xlu1 %426 }
  0xe7   : > { %v436_v6 = vsel %vm432_vm3, %v423_v61, %v425_v5  ;;  %v435_v12 = vsel %vm432_vm3, %v425_v5, %v427_v7  ;;  %680 = vmatprep.mubr.f32.mxu1 %v3729_v0 }
  0xe8   : > { %2121 = vmatprep.subr.msk.mxu0 %vm3727_vm13, %v435_v12  ;;  %vm356_vm13 = vcmp.ge.s32.totalorder %v2810_v17, 0 }
  0xe9   : > { %2122 = vmatpush1.msk.msra.mxu0 %vm3726_vm14, %v436_v6  ;;  %vm357_vm14 = vcmp.ge.s32.totalorder %v2803_v13, 0 }
  0xea   : > { %v480_v16 = vpop.permute.xlu0 %479  ;;  %2118 = vmatmul.mubr.msk.f32.gmra.mxu1 %vm526_vm6, %v2742_v49  ;;  %2123 = vmatmul.mubr.msk.f32.vlgmr.msra.gmra.mxu0 %vm526_vm6, %v2720_v42  ;;  %v429_v23 = vpop.permute.xlu1 %428 }
  0xeb   : > { %v482_v19 = vsel %vm481_vm0, %v478_v53, %v480_v16  ;;  %v489_v20 = vsel %vm481_vm0, %v480_v16, %v2676_v21  ;;  %757 = vmatprep.mubr.f32.mxu0 %v3729_v0  ;;  %828 = vmatprep.mubr.f32.mxu1 %v3729_v0  ;;  %v434_v25 = vsel %vm432_vm3, %v427_v7, %v429_v23 }
  0xec   : > { %2125 = vmatprep.subr.msk.mxu1 %vm397_vm15, %v489_v20  ;;  %v433_v21 = vsel %vm432_vm3, %v429_v23, %v2706_v37 }
  0xed   : > { %2126 = vmatpush1.msk.msra.mxu1 %vm396_vm10, %v482_v19 }
  0xee   : > { %2124 = vmatmul.mubr.msk.f32.gmra.mxu0 %vm526_vm6, %v2742_v49  ;;  %792 = vmatprep.subr.mxu1 %v2619_v4 }
  0xef   : > { %793 = vmatpush1.msra.mxu1 %v2635_v8  ;;  %1307 = vmatprep.mubr.f32.mxu0 %v3729_v0 }
  0xf0   : > { %2127 = vmatprep.subr.msk.mxu1 %vm357_vm14, %v433_v21 }
  0xf1   : > { %2128 = vmatpush1.msk.msra.mxu1 %vm356_vm13, %v434_v25 }
  0xf2   : > { %2129 = vmatmul.mubr.msk.f32.vlgmr.msra.gmra.mxu1 %vm526_vm6, %v2720_v42 }
  0xf3   : > { %834 = vmatprep.mubr.f32.mxu1 %v3729_v0 }
  0xf6   : > { %2130 = vmatmul.mubr.msk.f32.gmra.mxu1 %vm526_vm6, %v2742_v49 }
  0xf7   : > { %1384 = vmatprep.mubr.f32.mxu1 %v3729_v0  ;;  %v2845_v4 = vpop.permute.xlu0 %518  ;;  %v2850_v28 = vpop.permute.xlu1 %523 }
 0x19a   : > { %v599_v8 = vpop.f32.mrf.mxu0 }
 0x19b   : > { %v2848_v26 = vadd.f32 %v599_v8, %v2845_v4 }
 0x19c   : > { %v601_v27 = vpop.f32.mrf.mxu0 }
 0x19d   : > { %v602_v30 = vadd.f32 %v601_v27, %v2845_v4  ;;  %v841_v33 = vmax.f32 %v2848_v26, 0.0 }
 0x19e   : > { %v605_v31 = vpop.f32.mrf.mxu0 }
 0x19f   : > { %v2854_v32 = vadd.f32 %v605_v31, %v2850_v28  ;;  %v842_v37 = vmax.f32 %v602_v30, 0.0 }
 0x1a0   : > { %v607_v35 = vpop.f32.mrf.mxu0 }
 0x1a1   : > { %v608_v36 = vadd.f32 %v607_v35, %v2850_v28  ;;  %v849_v39 = vmax.f32 %v2854_v32, 0.0 }
 0x1a3   : > { %v850_v40 = vmax.f32 %v608_v36, 0.0  ;;  %v857_v41 = vadd.f32 %v849_v39, %v841_v33 }
 0x1a5   : > { %v864_v42 = vadd.f32 %v850_v40, %v842_v37  ;;  %v858_v44 = vrot.slane %v857_v41, 4 }
 0x1a6   : > { %v676_v45 = vpop.f32.mrf.mxu1 }
 0x1a7   : > { %v865_v47 = vrot.slane %v864_v42, 4  ;;  %v859_v48 = vadd.f32 %v858_v44, %v857_v41  ;;  %v2864_v52 = vadd.f32 %v676_v45, %v2845_v4 }
 0x1a8   : > { %v678_v49 = vpop.f32.mrf.mxu1 }
 0x1a9   : > { %v866_v51 = vadd.f32 %v865_v47, %v864_v42  ;;  %v860_v53 = vrot.slane %v859_v48, 2  ;;  %v2867_v55 = vadd.f32 %v678_v49, %v2845_v4  ;;  %v843_v7 = vmax.f32 %v2864_v52, 0.0 }
 0x1aa   : > { %v682_v56 = vpop.f32.mrf.mxu1  ;;  %v753_v57 = vpop.f32.mrf.mxu0 }
 0x1ab   : > { %v867_v59 = vrot.slane %v866_v51, 2  ;;  %v2870_v60 = vadd.f32 %v682_v56, %v2850_v28  ;;  %v2873_v61 = vadd.f32 %v753_v57, %v2845_v4  ;;  %v861_v2 = vadd.f32 %v860_v53, %v859_v48 }
 0x1ac   : > { %v684_v63 = vpop.f32.mrf.mxu1  ;;  %v755_v1 = vpop.f32.mrf.mxu0  ;;  %v844_v16 = vmax.f32 %v2867_v55, 0.0 }
 0x1ad   : > { %v868_v5 = vadd.f32 %v867_v59, %v866_v51  ;;  %v851_v6 = vmax.f32 %v2870_v60, 0.0  ;;  %v2878_v12 = vadd.f32 %v684_v63, %v2850_v28  ;;  %v3734_v8 = vmax.f32 %v2873_v61, 0.0 }
 0x1ae   : > { %v759_v19 = vpop.f32.mrf.mxu0  ;;  %v2891_v27 = vadd.f32 %v755_v1, %v2845_v4  ;;  %v862_v31 = vrot.slane %v861_v2, 1 }
 0x1af   : > { %v869_v20 = vrot.slane %v868_v5, 1  ;;  %v871_v23 = vadd.f32 %v851_v6, %v843_v7  ;;  %v3735_v25 = vmax.f32 %v2878_v12, 0.0  ;;  %v2887_v21 = vadd.f32 %v759_v19, %v2850_v28 }
 0x1b0   : > { %v761_v30 = vpop.f32.mrf.mxu0  ;;  %v3732_v53 = vmax.f32 %v2891_v27, 0.0  ;;  %v863_v63 = vadd.f32 %v862_v31, %v861_v2 }
 0x1b1   : > { %v870_v35 = vadd.f32 %v869_v20, %v868_v5  ;;  %v872_v36 = vrot.slane %v871_v23, 4  ;;  %v878_v41 = vadd.f32 %v3735_v25, %v844_v16  ;;  %v3733_v42 = vmax.f32 %v2887_v21, 0.0 }
 0x1b2   : > { %v2899_v44 = vadd.f32 %v761_v30, %v2850_v28  ;;  %v830_v45 = vpop.f32.mrf.mxu1  ;;  %v914_v14 = vmul.f32 0.0625, %v863_v63 }
 0x1b3   : > { %v915_v47 = vmul.f32 0.0625, %v870_v35  ;;  %v873_v48 = vadd.f32 %v872_v36, %v871_v23  ;;  %v879_v49 = vrot.slane %v878_v41, 4  ;;  %v885_v51 = vadd.f32 %v3733_v42, %v3734_v8 }
 0x1b4   : > { %v3731_v56 = vmax.f32 %v2899_v44, 0.0  ;;  %v2908_v57 = vadd.f32 %v830_v45, %v2845_v4  ;;  %v832_v59 = vpop.f32.mrf.mxu1 }
 0x1b5   : > { %v2910_v1 = vsub.f32 %v842_v37, %v915_v47  ;;  %v2912_v5 = vsub.f32 %v850_v40, %v915_v47  ;;  %v874_v19 = vrot.slane %v873_v48, 2  ;;  %v880_v20 = vadd.f32 %v879_v49, %v878_v41 }
 0x1b6   : > { %v886_v23 = vrot.slane %v885_v51, 4  ;;  %v892_v30 = vadd.f32 %v3731_v56, %v3732_v53  ;;  %v2919_v35 = vadd.f32 %v832_v59, %v2845_v4  ;;  %v836_v36 = vpop.f32.mrf.mxu1  ;;  %v3739_v4 = vmax.f32 %v2908_v57, 0.0 }
 0x1b7   : > { %v939_v45 = vmul.f32 %v2910_v1, %v2910_v1  ;;  %v947_v37 = vmul.f32 %v2912_v5, %v2912_v5  ;;  %v875_v40 = vadd.f32 %v874_v19, %v873_v48  ;;  %v881_v2 = vrot.slane %v880_v20, 2 }
 0x1b8   : > { %v887_v31 = vadd.f32 %v886_v23, %v885_v51  ;;  %v893_v41 = vrot.slane %v892_v30, 4  ;;  %v2926_v47 = vadd.f32 %v836_v36, %v2850_v28  ;;  %v838_v49 = vpop.f32.mrf.mxu1  ;;  %v3737_v8 = vmax.f32 %v2919_v35, 0.0 }
 0x1b9   : > { %v876_v0 = vrot.slane %v875_v40, 1  ;;  %v882_v56 = vadd.f32 %v881_v2, %v880_v20  ;;  %v2930_v59 = vadd.f32 %v838_v49, %v2850_v28  ;;  %v961_v53 = vadd.f32 %v947_v37, %v939_v45 }
 0x1ba   : > { %v888_v42 = vrot.slane %v887_v31, 2  ;;  %v3738_v48 = vmax.f32 %v2926_v47, 0.0  ;;  %v894_v23 = vadd.f32 %v893_v41, %v892_v30  ;;  %v2941_v28 = vsub.f32 %v841_v33, %v914_v14 }
 0x1bb   : > { %v877_v51 = vadd.f32 %v876_v0, %v875_v40  ;;  %v883_v19 = vrot.slane %v882_v56, 1  ;;  %v3736_v36 = vmax.f32 %v2930_v59, 0.0  ;;  %v2949_v30 = vsub.f32 %v849_v39, %v914_v14 }
 0x1bc   : > { %v889_v25 = vadd.f32 %v888_v42, %v887_v31  ;;  %v899_v63 = vadd.f32 %v3738_v48, %v3739_v4  ;;  %v962_v42 = vrot.slane %v961_v53, 4  ;;  %v938_v14 = vmul.f32 %v2941_v28, %v2941_v28 }
 0x1bd   : > { %v916_v20 = vmul.f32 0.0625, %v877_v51  ;;  %v884_v45 = vadd.f32 %v883_v19, %v882_v56  ;;  %v906_v0 = vadd.f32 %v3736_v36, %v3737_v8  ;;  %v895_v56 = vrot.slane %v894_v23, 2 }
 0x1be   : > { %v890_v37 = vrot.slane %v889_v25, 1  ;;  %v900_v40 = vrot.slane %v899_v63, 4  ;;  %v946_v60 = vmul.f32 %v2949_v30, %v2949_v30  ;;  %v3760_v17 = vmax.f32 %v2908_v57, 0.0 }
 0x1bf   : > { %v2953_v2 = vsub.f32 %v843_v7, %v916_v20  ;;  %v2957_v26 = vsub.f32 %v851_v6, %v916_v20  ;;  %v917_v33 = vmul.f32 0.0625, %v884_v45  ;;  %v907_v49 = vrot.slane %v906_v0, 4 }
 0x1c0   : > { %v891_v31 = vadd.f32 %v890_v37, %v889_v25  ;;  %v901_v41 = vadd.f32 %v900_v40, %v899_v63  ;;  %v963_v7 = vadd.f32 %v962_v42, %v961_v53  ;;  %v3757_v6 = vmax.f32 %v2878_v12, 0.0 }
 0x1c1   : > { %v940_v32 = vmul.f32 %v2953_v2, %v2953_v2  ;;  %v948_v39 = vmul.f32 %v2957_v26, %v2957_v26  ;;  %v2967_v52 = vsub.f32 %v844_v16, %v917_v33  ;;  %v896_v45 = vadd.f32 %v895_v56, %v894_v23 }
 0x1c2   : > { %v2973_v25 = vsub.f32 %v3757_v6, %v917_v33  ;;  %v918_v51 = vmul.f32 0.0625, %v891_v31  ;;  %v902_v19 = vrot.slane %v901_v41, 2  ;;  %v908_v37 = vadd.f32 %v907_v49, %v906_v0 }
 0x1c3   : > { %v968_v63 = vadd.f32 %v948_v39, %v940_v32  ;;  %v941_v20 = vmul.f32 %v2967_v52, %v2967_v52  ;;  %v3758_v16 = vmax.f32 %v2873_v61, 0.0  ;;  %v3759_v53 = vmax.f32 %v2887_v21, 0.0 }
 0x1c4   : > { %v949_v55 = vmul.f32 %v2973_v25, %v2973_v25  ;;  %v903_v33 = vadd.f32 %v902_v19, %v901_v41  ;;  %v909_v31 = vrot.slane %v908_v37, 2  ;;  %v964_v32 = vrot.slane %v963_v7, 2 }
 0x1c5   : > { %v2981_v40 = vsub.f32 %v3758_v16, %v918_v51  ;;  %v2985_v12 = vsub.f32 %v3759_v53, %v918_v51  ;;  %v969_v42 = vrot.slane %v968_v63, 4  ;;  %v954_v6 = vadd.f32 %v946_v60, %v938_v14 }
 0x1c6   : > { %v975_v39 = vadd.f32 %v949_v55, %v941_v20  ;;  %v897_v23 = vrot.slane %v896_v45, 1  ;;  %v904_v0 = vrot.slane %v903_v33, 1  ;;  %v910_v16 = vadd.f32 %v909_v31, %v908_v37 }
 0x1c7   : > { %v970_v36 = vadd.f32 %v969_v42, %v968_v63  ;;  %v942_v49 = vmul.f32 %v2981_v40, %v2981_v40  ;;  %v950_v61 = vmul.f32 %v2985_v12, %v2985_v12  ;;  %v965_v53 = vadd.f32 %v964_v32, %v963_v7 }
 0x1c8   : > { %v976_v56 = vrot.slane %v975_v39, 4  ;;  %v905_v51 = vadd.f32 %v904_v0, %v903_v33  ;;  %v911_v41 = vrot.slane %v910_v16, 1  ;;  %v955_v19 = vrot.slane %v954_v6, 4 }
 0x1c9   : > { %v971_v21 = vrot.slane %v970_v36, 2  ;;  %v898_v20 = vadd.f32 %v897_v23, %v896_v45  ;;  %v982_v63 = vadd.f32 %v950_v61, %v942_v49  ;;  %v3761_v37 = vmax.f32 %v2926_v47, 0.0 }
 0x1ca   : > { %v977_v8 = vadd.f32 %v976_v56, %v975_v39  ;;  %v920_v14 = vmul.f32 0.0625, %v905_v51  ;;  %v912_v55 = vadd.f32 %v911_v41, %v910_v16  ;;  %v956_v42 = vadd.f32 %v955_v19, %v954_v6 }
 0x1cb   : > { %v972_v48 = vadd.f32 %v971_v21, %v970_v36  ;;  %v966_v7 = vrot.slane %v965_v53, 1  ;;  %v919_v36 = vmul.f32 0.0625, %v898_v20  ;;  %v983_v0 = vrot.slane %v982_v63, 4 }
 0x1cc   : > { %v978_v60 = vrot.slane %v977_v8, 2  ;;  %v2993_v13 = vsub.f32 %v3760_v17, %v920_v14  ;;  %v2997_v31 = vsub.f32 %v3761_v37, %v920_v14  ;;  %v921_v33 = vmul.f32 0.0625, %v912_v55 }
 0x1cd   : > { %v973_v4 = vrot.slane %v972_v48, 1  ;;  %v957_v32 = vrot.slane %v956_v42, 2  ;;  %v3762_v17 = vmax.f32 %v2919_v35, 0.0  ;;  %v3763_v47 = vmax.f32 %v2930_v59, 0.0 }
 0x1ce   : > { %v944_v45 = vmul.f32 %v2993_v13, %v2993_v13  ;;  %v952_v6 = vmul.f32 %v2997_v31, %v2997_v31  ;;  %v979_v23 = vadd.f32 %v978_v60, %v977_v8  ;;  %v967_v21 = vadd.f32 %v966_v7, %v965_v53 }
 0x1cf   : > { %v974_v39 = vadd.f32 %v973_v4, %v972_v48  ;;  %v3005_v57 = vsub.f32 %v3762_v17, %v921_v33  ;;  %v3009_v56 = vsub.f32 %v3763_v47, %v921_v33  ;;  %v958_v4 = vadd.f32 %v957_v32, %v956_v42 }
 0x1d0   : > { %v996_v61 = vadd.f32 %v952_v6, %v944_v45  ;;  %v980_v41 = vrot.slane %v979_v23, 1  ;;  %v984_v35 = vadd.f32 %v983_v0, %v982_v63  ;;  %v3764_v19 = vmax.f32 %v2891_v27, 0.0 }
 0x1d1   : > { %v1012_v49 = vmul.f32 0.0625, %v974_v39  ;;  %v945_v48 = vmul.f32 %v3005_v57, %v3005_v57  ;;  %v953_v16 = vmul.f32 %v3009_v56, %v3009_v56  ;;  %v959_v51 = vrot.slane %v958_v4, 1 }
 0x1d2   : > { %v3017_v20 = vsub.f32 %v3764_v19, %v919_v36  ;;  %v3765_v59 = vmax.f32 %v2899_v44, 0.0  ;;  %v997_v60 = vrot.slane %v996_v61, 4  ;;  %v1011_v33 = vmul.f32 0.0625, %v967_v21 }
 0x1d3   : > { %v1020_v8 = vadd.f32 1e-05, %v1012_v49  ;;  %v1003_v55 = vadd.f32 %v953_v16, %v945_v48  ;;  %v960_v42 = vadd.f32 %v959_v51, %v958_v4  ;;  %v985_v32 = vrot.slane %v984_v35, 2  ;;  %v3027_v49 = vpop.permute.xlu1 %1055 }
 0x1d4   : > { %v3021_v14 = vsub.f32 %v3765_v59, %v919_v36  ;;  %v943_v53 = vmul.f32 %v3017_v20, %v3017_v20  ;;  %v981_v27 = vadd.f32 %v980_v41, %v979_v23  ;;  %v998_v7 = vadd.f32 %v997_v60, %v996_v61 }
 0x1d5   : > { %2263 = vrsqrt.f32 %v1020_v8  ;;  %v1010_v37 = vmul.f32 0.0625, %v960_v42  ;;  %v1004_v39 = vrot.slane %v1003_v55, 4  ;;  %v986_v44 = vadd.f32 %v985_v32, %v984_v35 }
 0x1d6   : > { %v951_v63 = vmul.f32 %v3021_v14, %v3021_v14  ;;  %v1019_v6 = vadd.f32 1e-05, %v1011_v33  ;;  %v1013_v0 = vmul.f32 0.0625, %v981_v27  ;;  %v999_v17 = vrot.slane %v998_v7, 2 }
 0x1d7   : > { %v1018_v45 = vadd.f32 1e-05, %v1010_v37  ;;  %v1005_v47 = vadd.f32 %v1004_v39, %v1003_v55  ;;  %v987_v4 = vrot.slane %v986_v44, 1  ;;  %v3030_v19 = vpop.permute.xlu1 %1079 }
 0x1d8   : > { %v989_v36 = vadd.f32 %v951_v63, %v943_v53  ;;  %v1021_v16 = vadd.f32 1e-05, %v1013_v0  ;;  %v1000_v21 = vadd.f32 %v999_v17, %v998_v7  ;;  %v3037_v53 = vpop.permute.xlu0 %1051 }
 0x1d9   : > { %2265 = vrsqrt.f32 %v1018_v45  ;;  %v1006_v8 = vrot.slane %v1005_v47, 2  ;;  %v988_v61 = vadd.f32 %v987_v4, %v986_v44 }
 0x1da   : > { %v990_v48 = vrot.slane %v989_v36, 4  ;;  %2267 = vrsqrt.f32 %v1019_v6  ;;  %v1001_v35 = vrot.slane %v1000_v21, 1 }
 0x1db   : > { %2269 = vrsqrt.f32 %v1021_v16  ;;  %v1007_v59 = vadd.f32 %v1006_v8, %v1005_v47  ;;  %v1014_v33 = vmul.f32 0.0625, %v988_v61  ;;  %v3043_v39 = vpop.permute.xlu1 %1075 }
 0x1dc   : > { %v991_v41 = vadd.f32 %v990_v48, %v989_v36 }
 0x1dd   : > { %v1008_v63 = vrot.slane %v1007_v59, 1  ;;  %v1022_v36 = vadd.f32 1e-05, %v1014_v33 }
 0x1de   : > { %v992_v32 = vrot.slane %v991_v41, 2 }
 0x1df   : > { %v1009_v17 = vadd.f32 %v1008_v63, %v1007_v59  ;;  %2271 = vrsqrt.f32 %v1022_v36 }
 0x1e0   : > { %v993_v6 = vadd.f32 %v992_v32, %v991_v41 }
 0x1e2   : > { %v2264_v51 = vpop.eup %2263  ;;  %v994_v48 = vrot.slane %v993_v6, 1 }
 0x1e3   : > { %v1044_v23 = vmul.f32 %v2264_v51, %v2957_v26  ;;  %v1036_v42 = vmul.f32 %v2264_v51, %v2953_v2  ;;  %v1002_v26 = vadd.f32 %v1001_v35, %v1000_v21  ;;  %v1017_v21 = vmul.f32 0.0625, %v1009_v17 }
 0x1e4   : > { %v995_v61 = vadd.f32 %v994_v48, %v993_v6 }
 0x1e5   : > { %v1068_v60 = vmul.f32 %v3027_v49, %v1044_v23  ;;  %v1060_v2 = vmul.f32 %v3037_v53, %v1036_v42  ;;  %v1016_v0 = vmul.f32 0.0625, %v1002_v26  ;;  %v1025_v41 = vadd.f32 1e-05, %v1017_v21 }
 0x1e6   : > { %v2266_v37 = vpop.eup %2265 }
 0x1e7   : > { %v3034_v55 = vadd.f32 %v3030_v19, %v1068_v60  ;;  %v1042_v27 = vmul.f32 %v2266_v37, %v2949_v30  ;;  %v1034_v7 = vmul.f32 %v2266_v37, %v2941_v28  ;;  %v2268_v4 = vpop.eup %2267  ;;  %v3057_v28 = vadd.f32 %v3043_v39, %v1060_v2 }
 0x1e8   : > { %v1024_v16 = vadd.f32 1e-05, %v1016_v0  ;;  %v1035_v8 = vmul.f32 %v2268_v4, %v2910_v1  ;;  %v2270_v51 = vpop.eup %2269  ;;  %v1043_v23 = vmul.f32 %v2268_v4, %v2912_v5  ;;  %v1015_v1 = vmul.f32 0.0625, %v995_v61 }
 0x1e9   : > { %1172 = vrot.lane.b32.xlu1 %v3034_v55, %s2439_s30  ;;  %v1066_v45 = vmul.f32 %v3027_v49, %v1042_v27  ;;  %v1058_v44 = vmul.f32 %v3037_v53, %v1034_v7  ;;  %v1037_v59 = vmul.f32 %v2270_v51, %v2967_v52  ;;  %v1045_v42 = vmul.f32 %v2270_v51, %v2973_v25 }
 0x1ea   : > { %2273 = vrsqrt.f32 %v1024_v16  ;;  %v1059_v35 = vmul.f32 %v3037_v53, %v1035_v8  ;;  %v1067_v60 = vmul.f32 %v3027_v49, %v1043_v23  ;;  %v1023_v52 = vadd.f32 1e-05, %v1015_v1 }
 0x1eb   : > { %v3049_v47 = vadd.f32 %v3030_v19, %v1066_v45  ;;  %v3052_v30 = vadd.f32 %v3043_v39, %v1058_v44  ;;  %2275 = vrsqrt.f32 %v1025_v41  ;;  %v1061_v37 = vmul.f32 %v3037_v53, %v1037_v59 }
 0x1ec   : > { %v3076_v5 = vadd.f32 %v3043_v39, %v1059_v35  ;;  %v3084_v33 = vadd.f32 %v3030_v19, %v1067_v60  ;;  %v1069_v32 = vmul.f32 %v3027_v49, %v1045_v42  ;;  %v2272_v26 = vpop.eup %2271  ;;  %2277 = vrsqrt.f32 %v1023_v52 }
 0x1ed   : > { %1164 = vrot.lane.b32.xlu0 %v3049_v47, %s2439_s30  ;;  %1162 = vrot.lane.b32.xlu1 %v3052_v30, %s2439_s30  ;;  %v3088_v25 = vadd.f32 %v3043_v39, %v1061_v37  ;;  %v1046_v63 = vmul.f32 %v2272_v26, %v2985_v12  ;;  %v1038_v45 = vmul.f32 %v2272_v26, %v2981_v40  ;;  %v2448_v59 = vmov 7  }
 0x1ee   : > { %v3096_v27 = vadd.f32 %v3030_v19, %v1069_v32 }
 0x1ef   : > { %v1070_v44 = vmul.f32 %v3027_v49, %v1046_v63  ;;  %v1062_v12 = vmul.f32 %v3037_v53, %v1038_v45 }
 0x1f1   : > { %1170 = vrot.lane.b32.xlu0 %v3057_v28, %s2439_s30  ;;  %1098 = vrot.lane.b32.xlu1 %v3052_v30, %s2440_s28  ;;  %v3112_v0 = vadd.f32 %v3030_v19, %v1070_v44  ;;  %v3121_v17 = vadd.f32 %v3043_v39, %v1062_v12 }
 0x1f5   : > { %1100 = vrot.lane.b32.xlu0 %v3049_v47, %s2440_s28  ;;  %1106 = vrot.lane.b32.xlu1 %v3057_v28, %s2440_s28 }
 0x1f7   : > { %v2274_v7 = vpop.eup %2273 }
 0x1f8   : > { %v1048_v2 = vmul.f32 %v2274_v7, %v2997_v31  ;;  %v2276_v36 = vpop.eup %2275  ;;  %v1040_v6 = vmul.f32 %v2274_v7, %v2993_v13 }
 0x1f9   : > { %1108 = vrot.lane.b32.xlu0 %v3034_v55, %s2440_s28  ;;  %1166 = vrot.lane.b32.xlu1 %v3076_v5, %s2439_s30  ;;  %v1041_v31 = vmul.f32 %v2276_v36, %v3005_v57  ;;  %v2278_v4 = vpop.eup %2277  ;;  %v1049_v48 = vmul.f32 %v2276_v36, %v3009_v56 }
 0x1fa   : > { %v1072_v40 = vmul.f32 %v3027_v49, %v1048_v2  ;;  %v1064_v13 = vmul.f32 %v3037_v53, %v1040_v6  ;;  %v1047_v57 = vmul.f32 %v2278_v4, %v3021_v14  ;;  %v1039_v23 = vmul.f32 %v2278_v4, %v3017_v20 }
 0x1fb   : > { %v1065_v21 = vmul.f32 %v3037_v53, %v1041_v31  ;;  %v1073_v56 = vmul.f32 %v3027_v49, %v1049_v48 }
 0x1fc   : > { %v3126_v16 = vadd.f32 %v3030_v19, %v1072_v40  ;;  %v3135_v8 = vadd.f32 %v3043_v39, %v1064_v13  ;;  %v1071_v14 = vmul.f32 %v3027_v49, %v1047_v57  ;;  %v1063_v41 = vmul.f32 %v3037_v53, %v1039_v23 }
 0x1fd   : > { %1168 = vrot.lane.b32.xlu0 %v3084_v33, %s2439_s30  ;;  %1174 = vrot.lane.b32.xlu1 %v3088_v25, %s2439_s30  ;;  %v3139_v51 = vadd.f32 %v3043_v39, %v1065_v21  ;;  %v3147_v61 = vadd.f32 %v3030_v19, %v1073_v56  ;;  %v2444_v49 = vmov 3   ;;  %v2446_v53 = vmov 5  }
 0x1fe   : > { %v3156_v20 = vadd.f32 %v3030_v19, %v1071_v14  ;;  %v3159_v35 = vadd.f32 %v3043_v39, %v1063_v41  ;;  %2255 = vset.pattern.permute.xlu1 %v2444_v49  ;;  %2254 = vset.pattern.permute.xlu0 %v2444_v49  ;;  %v2445_v19 = vmov 4   ;;  %v2447_v39 = vmov 6   ;;  %v3269_v41 = vld [vmem:[#allocation7] sm:$0xff] }
 0x201   : > { %1176 = vrot.lane.b32.xlu0 %v3096_v27, %s2439_s30  ;;  %1104 = vrot.lane.b32.xlu1 %v3084_v33, %s2440_s28 }
 0x205   : > { %1102 = vrot.lane.b32.xlu0 %v3076_v5, %s2440_s28  ;;  %1112 = vrot.lane.b32.xlu1 %v3096_v27, %s2440_s28 }
 0x209   : > { %1110 = vrot.lane.b32.xlu0 %v3088_v25, %s2440_s28  ;;  %1180 = vrot.lane.b32.xlu1 %v3112_v0, %s2439_s30 }
 0x20d   : > { %1178 = vrot.lane.b32.xlu0 %v3121_v17, %s2439_s30  ;;  %1188 = vrot.lane.b32.xlu1 %v3126_v16, %s2439_s30 }
 0x211   : > { %1186 = vrot.lane.b32.xlu0 %v3135_v8, %s2439_s30  ;;  %1126 = vrot.lane.b32.xlu1 %v3139_v51, %s2440_s28 }
 0x215   : > { %1128 = vrot.lane.b32.xlu0 %v3147_v61, %s2440_s28  ;;  %1114 = vrot.lane.b32.xlu1 %v3121_v17, %s2440_s28 }
 0x219   : > { %1184 = vrot.lane.b32.xlu0 %v3156_v20, %s2439_s30  ;;  %1182 = vrot.lane.b32.xlu1 %v3159_v35, %s2439_s30 }
 0x21d   : > { %1192 = vrot.lane.b32.xlu0 %v3147_v61, %s2439_s30  ;;  %1190 = vrot.lane.b32.xlu1 %v3139_v51, %s2439_s30  ;;  %s1975_s30 = sadd.s32 3, %s3560_s19  ;;  %s2106_s19 = sshll.u32 %s2591_s7, 3 }
 0x21e   : > { %s235_s27 = scalar_lea.vmem [#allocation9], %s2106_s19 }
 0x221   : > { %1116 = vrot.lane.b32.xlu0 %v3112_v0, %s2440_s28  ;;  %1120 = vrot.lane.b32.xlu1 %v3156_v20, %s2440_s28 }
 0x225   : > { %1124 = vrot.lane.b32.xlu0 %v3126_v16, %s2440_s28  ;;  %1122 = vrot.lane.b32.xlu1 %v3135_v8, %s2440_s28 }
 0x229   : > { %1118 = vrot.lane.b32.xlu0 %v3159_v35, %s2440_s28  ;;  %1233 = vperm.xlu1 %2255, %v2656_v10   ;;  %s3639_s28 = sld [smem:[#allocation3 + %s1975_s30]] }
 0x22d   : > { %1229 = vperm.xlu0 %2254, %v2661_v11   ;;  %2256 = vset.pattern.permute.xlu1 %v2445_v19 }
 0x22e   : > { %1760 = vperm.xlu1 %2256, %v2661_v11  }
 0x231   : > { %2257 = vset.pattern.permute.xlu0 %v2445_v19 }
 0x232   : > { %2258 = vset.pattern.permute.xlu1 %v2446_v53  ;;  %1764 = vperm.xlu0 %2257, %v2656_v10  }
 0x233   : > { %1784 = vperm.xlu1 %2258, %v2661_v11  }
 0x236   : > { %2259 = vset.pattern.permute.xlu0 %v2447_v39 }
 0x237   : > { %1788 = vperm.xlu1 %2258, %v2656_v10   ;;  %1808 = vperm.xlu0 %2259, %v2661_v11  }
 0x23b   : > { %2260 = vset.pattern.permute.xlu1 %v2447_v39  ;;  %2262 = vset.pattern.permute.xlu0 %v2448_v59 }
 0x23c   : > { %1812 = vperm.xlu1 %2260, %v2656_v10  }
 0x240   : > { %2261 = vset.pattern.permute.xlu1 %v2448_v59 }
 0x241   : > { %1888 = vperm.xlu1 %2261, %v2661_v11  }
 0x25b   : > { %v1173_v1 = vpop.permute.xlu1 %1172 }
 0x25f   : > { %v3188_v60 = vpop.permute.xlu0 %1164  ;;  %v3190_v42 = vpop.permute.xlu1 %1162 }
 0x263   : > { %v1171_v37 = vpop.permute.xlu0 %1170  ;;  %v1099_v52 = vpop.permute.xlu1 %1098 }
 0x267   : > { %v1101_v32 = vpop.permute.xlu0 %1100  ;;  %v1107_v26 = vpop.permute.xlu1 %1106 }
 0x26b   : > { %v1109_v63 = vpop.permute.xlu0 %1108  ;;  %v1167_v7 = vpop.permute.xlu1 %1166 }
 0x26c   : > { %v1204_v11 = vsel %vm481_vm0, %v1167_v7, %v1171_v37  ;;  %v1206_v36 = vsel %vm481_vm0, %v3190_v42, %v1167_v7 }
 0x26f   : > { %v1169_v45 = vpop.permute.xlu0 %1168  ;;  %v1175_v2 = vpop.permute.xlu1 %1174 }
 0x270   : > { %v1205_v44 = vsel %vm481_vm0, %v1169_v45, %v1173_v1  ;;  %v1207_v10 = vsel %vm481_vm0, %v3188_v60, %v1169_v45  ;;  %v1202_v13 = vsel %vm481_vm0, %v1171_v37, %v1175_v2 }
 0x271   : > { %2131 = vmatprep.subr.msk.mxu0 %vm391_vm1, %v1205_v44 }
 0x272   : > { %2132 = vmatpush1.msk.msra.mxu0 %vm390_vm2, %v1207_v10 }
 0x273   : > { %v1177_v12 = vpop.permute.xlu0 %1176  ;;  %2133 = vmatprep.subr.msk.mxu0 %vm391_vm1, %v1204_v11  ;;  %v1105_v6 = vpop.permute.xlu1 %1104  ;;  %vm1236_vm1 = vcmask 392192  }
 0x274   : > { %2134 = vmatpush1.msk.msra.mxu0 %vm390_vm2, %v1206_v36  ;;  %v1143_v40 = vsel %vm432_vm3, %v1101_v32, %v1105_v6  ;;  %v1141_v34 = vsel %vm432_vm3, %v1105_v6, %v1109_v63  ;;  %vm3767_vm2 = vcmp.lt.s32.totalorder %v2732_v46, 128 }
 0x275   : > { %1267 = vmatprep.subr.mxu0 %v3084_v33 }
 0x276   : > { %1268 = vmatpush1.msra.mxu0 %v3049_v47  ;;  %v1203_v47 = vsel %vm481_vm0, %v1173_v1, %v1177_v12 }
 0x277   : > { %v1103_v31 = vpop.permute.xlu0 %1102  ;;  %1269 = vmatprep.subr.mxu0 %v3076_v5  ;;  %v3215_v4 = vpop.permute.xlu1 %1112 }
 0x278   : > { %1270 = vmatpush1.msra.mxu0 %v3052_v30  ;;  %v1139_v56 = vsel %vm432_vm3, %v1109_v63, %v3215_v4  ;;  %v1140_v23 = vsel %vm432_vm3, %v1103_v31, %v1107_v26  ;;  %v1142_v14 = vsel %vm432_vm3, %v1099_v52, %v1103_v31 }
 0x279   : > { %2135 = vmatprep.subr.msk.mxu0 %vm351_vm4, %v1143_v40 }
 0x27b   : > { %v3220_v18 = vpop.permute.xlu0 %1110  ;;  %v1181_v22 = vpop.permute.xlu1 %1180 }
 0x27c   : > { %v1201_v33 = vsel %vm481_vm0, %v1177_v12, %v1181_v22 }
 0x27d   : > { %2141 = vmatprep.subr.msk.mxu1 %vm393_vm7, %v1201_v33 }
 0x27e   : > { %2142 = vmatpush1.msk.msra.mxu1 %vm392_vm8, %v1203_v47 }
 0x27f   : > { %v1179_v5 = vpop.permute.xlu0 %1178  ;;  %v1189_v30 = vpop.permute.xlu1 %1188 }
 0x280   : > { %v1200_v48 = vsel %vm481_vm0, %v1175_v2, %v1179_v5 }
 0x281   : > { %2143 = vmatprep.subr.msk.mxu1 %vm393_vm7, %v1200_v48 }
 0x282   : > { %2144 = vmatpush1.msk.msra.mxu1 %vm392_vm8, %v1202_v13 }
 0x283   : > { %v1187_v21 = vpop.permute.xlu0 %1186  ;;  %1344 = vmatprep.subr.mxu1 %v3096_v27  ;;  %v3239_v57 = vpop.permute.xlu1 %1126 }
 0x284   : > { %1345 = vmatpush1.msra.mxu1 %v3034_v55  ;;  %v1138_v55 = vsel %vm432_vm3, %v1107_v26, %v3220_v18 }
 0x285   : > { %1346 = vmatprep.subr.mxu1 %v3088_v25 }
 0x286   : > { %1347 = vmatpush1.msra.mxu1 %v3057_v28  ;;  %v1144_v28 = vsel %vm432_vm3, %v3239_v57, %v1099_v52 }
 0x287   : > { %v1129_v38 = vpop.permute.xlu0 %1128  ;;  %2145 = vmatprep.subr.msk.mxu1 %vm353_vm11, %v1139_v56  ;;  %v3251_v27 = vpop.permute.xlu1 %1114 }
 0x288   : > { %v1145_v25 = vsel %vm432_vm3, %v1129_v38, %v1101_v32  ;;  %2146 = vmatpush1.msk.msra.mxu1 %vm352_vm12, %v1141_v34  ;;  %v1136_v63 = vsel %vm432_vm3, %v3220_v18, %v3251_v27 }
 0x289   : > { %2136 = vmatpush1.msk.msra.mxu0 %vm350_vm5, %v1145_v25  ;;  %2147 = vmatprep.subr.msk.mxu1 %vm353_vm11, %v1138_v55 }
 0x28a   : > { %2137 = vmatprep.subr.msk.mxu0 %vm351_vm4, %v1142_v14  ;;  %2148 = vmatpush1.msk.msra.mxu1 %vm352_vm12, %v1140_v23  ;;  %vm3768_vm4 = vmmov %vm3767_vm2 }
 0x28b   : > { %v1185_v49 = vpop.permute.xlu0 %1184  ;;  %2138 = vmatpush1.msk.msra.mxu0 %vm350_vm5, %v1144_v28  ;;  %2149 = vmatmul.mubr.msk.f32.vlgmr.msra.gmra.mxu1 %vm1236_vm1, %v3269_v41  ;;  %v1183_v19 = vpop.permute.xlu1 %1182  ;;  %vm3770_vm5 = vcmp.ge.s32.totalorder %v2774_v62, 0 }
 0x28c   : > { %v1197_v53 = vsel %vm481_vm0, %v1185_v49, %v1189_v30  ;;  %2139 = vmatmul.mubr.msk.f32.vlgmr.msra.gmra.mxu0 %vm1236_vm1, %v3269_v41  ;;  %v1196_v24 = vsel %vm481_vm0, %v1183_v19, %v1187_v21  ;;  %v1199_v50 = vsel %vm481_vm0, %v1181_v22, %v1185_v49  ;;  %v1198_v39 = vsel %vm481_vm0, %v1179_v5, %v1183_v19  ;;  %vm3774_vm7 = vmmov %vm3770_vm5 }
 0x28d   : > { %2151 = vmatprep.subr.msk.mxu0 %vm395_vm9, %v1197_v53  ;;  %1313 = vmatprep.mubr.f32.mxu0 %v3766_v29 }
 0x28e   : > { %2152 = vmatpush1.msk.msra.mxu0 %vm3767_vm2, %v1199_v50  ;;  %1390 = vmatprep.mubr.f32.mxu1 %v3766_v29 }
 0x28f   : > { %v1193_v59 = vpop.permute.xlu0 %1192  ;;  %2150 = vmatmul.mubr.msk.f32.gmra.mxu1 %vm1236_vm1, %v1227_v54  ;;  %2153 = vmatprep.subr.msk.mxu0 %vm395_vm9, %v1196_v24  ;;  %v1191_v1 = vpop.permute.xlu1 %1190 }
 0x290   : > { %v1195_v37 = vsel %vm481_vm0, %v1189_v30, %v1193_v59  ;;  %v1209_v52 = vsel %vm481_vm0, %v1193_v59, %v3188_v60  ;;  %2140 = vmatmul.mubr.msk.f32.gmra.mxu0 %vm1236_vm1, %v1227_v54  ;;  %v1208_v32 = vsel %vm481_vm0, %v1191_v1, %v3190_v42  ;;  %v1194_v43 = vsel %vm481_vm0, %v1187_v21, %v1191_v1 }
 0x291   : > { %2161 = vmatprep.subr.msk.mxu1 %vm397_vm15, %v1209_v52  ;;  %2154 = vmatpush1.msk.msra.mxu0 %vm3768_vm4, %v1198_v39  ;;  %vm3769_vm0 = vcmp.ge.s32.totalorder %v2770_v58, 0 }
 0x292   : > { %2162 = vmatpush1.msk.msra.mxu1 %vm396_vm10, %v1195_v37  ;;  %1421 = vmatprep.subr.mxu0 %v3156_v20  ;;  %vm3773_vm6 = vmmov %vm3769_vm0 }
 0x293   : > { %v1117_v60 = vpop.permute.xlu0 %1116  ;;  %1422 = vmatpush1.msra.mxu0 %v3112_v0  ;;  %2163 = vmatprep.subr.msk.mxu1 %vm397_vm15, %v1208_v32  ;;  %v1121_v42 = vpop.permute.xlu1 %1120 }
 0x294   : > { %1423 = vmatprep.subr.mxu0 %v3159_v35  ;;  %2164 = vmatpush1.msk.msra.mxu1 %vm396_vm10, %v1194_v43  ;;  %v1135_v46 = vsel %vm432_vm3, %v1117_v60, %v1121_v42  ;;  %v1137_v0 = vsel %vm432_vm3, %v3215_v4, %v1117_v60 }
 0x295   : > { %1424 = vmatpush1.msra.mxu0 %v3121_v17  ;;  %1498 = vmatprep.subr.mxu1 %v3147_v61 }
 0x296   : > { %1499 = vmatpush1.msra.mxu1 %v3126_v16  ;;  %2155 = vmatprep.subr.msk.mxu0 %vm3769_vm0, %v1135_v46 }
 0x297   : > { %v1125_v3 = vpop.permute.xlu0 %1124  ;;  %1500 = vmatprep.subr.mxu1 %v3139_v51  ;;  %2156 = vmatpush1.msk.msra.mxu0 %vm3770_vm5, %v1137_v0  ;;  %v1123_v9 = vpop.permute.xlu1 %1122 }
 0x298   : > { %v1131_v17 = vsel %vm432_vm3, %v1125_v3, %v1129_v38  ;;  %1501 = vmatpush1.msra.mxu1 %v3135_v8  ;;  %v1130_v61 = vsel %vm432_vm3, %v1123_v9, %v3239_v57  ;;  %1461 = vmatprep.mubr.f32.mxu0 %v3766_v29  ;;  %v1133_v16 = vsel %vm432_vm3, %v1121_v42, %v1125_v3 }
 0x299   : > { %2165 = vmatprep.subr.msk.mxu1 %vm357_vm14, %v1131_v17  ;;  %1538 = vmatprep.mubr.f32.mxu1 %v3766_v29 }
 0x29a   : > { %2166 = vmatpush1.msk.msra.mxu1 %vm356_vm13, %v1133_v16 }
 0x29b   : > { %v1119_v35 = vpop.permute.xlu0 %1118  ;;  %2167 = vmatprep.subr.msk.mxu1 %vm357_vm14, %v1130_v61 }
 0x29c   : > { %v1134_v8 = vsel %vm432_vm3, %v3251_v27, %v1119_v35  ;;  %v1132_v26 = vsel %vm432_vm3, %v1119_v35, %v1123_v9 }
 0x29d   : > { %2157 = vmatprep.subr.msk.mxu0 %vm3773_vm6, %v1134_v8  ;;  %2168 = vmatpush1.msk.msra.mxu1 %vm356_vm13, %v1132_v26 }
 0x29e   : > { %2158 = vmatpush1.msk.msra.mxu0 %vm3774_vm7, %v1136_v63  ;;  %2169 = vmatmul.mubr.msk.f32.vlgmr.msra.gmra.mxu1 %vm1236_vm1, %v3269_v41 }
 0x29f   : > { %2159 = vmatmul.mubr.msk.f32.vlgmr.msra.gmra.mxu0 %vm1236_vm1, %v3269_v41  ;;  %1544 = vmatprep.mubr.f32.mxu1 %v3766_v29 }
 0x2a0   : > { %1467 = vmatprep.mubr.f32.mxu0 %v3766_v29 }
 0x2a2   : > { %2170 = vmatmul.mubr.msk.f32.gmra.mxu1 %vm1236_vm1, %v1227_v54 }
 0x2a3   : > { %2160 = vmatmul.mubr.msk.f32.gmra.mxu0 %vm1236_vm1, %v1227_v54 }
 0x2a4   : > { %v3384_v11 = vpop.permute.xlu1 %1233 }
 0x2a8   : > { %v3376_v58 = vpop.permute.xlu0 %1229 }
 0x34b   : > { %v1386_v7 = vpop.f32.mrf.mxu1 }
 0x34c   : > { %v1309_v45 = vpop.f32.mrf.mxu0  ;;  %v3379_v62 = vadd.f32 %v1386_v7, %v3376_v58 }
 0x34d   : > { %v3382_v2 = vadd.f32 %v1309_v45, %v3376_v58  ;;  %v1388_v44 = vpop.f32.mrf.mxu1 }
 0x34e   : > { %v1311_v10 = vpop.f32.mrf.mxu0  ;;  %v3387_v36 = vadd.f32 %v1388_v44, %v3376_v58  ;;  %v1553_v4 = vmax.f32 %v3379_v62, 0.0 }
 0x34f   : > { %v3390_v12 = vadd.f32 %v1311_v10, %v3376_v58  ;;  %v1392_v6 = vpop.f32.mrf.mxu1  ;;  %v1551_v22 = vmax.f32 %v3382_v2, 0.0 }
 0x350   : > { %v1315_v40 = vpop.f32.mrf.mxu0  ;;  %v1393_v31 = vadd.f32 %v1392_v6, %v3384_v11  ;;  %v1554_v47 = vmax.f32 %v3387_v36, 0.0 }
 0x351   : > { %v3395_v18 = vadd.f32 %v1315_v40, %v3384_v11  ;;  %v1394_v33 = vpop.f32.mrf.mxu1  ;;  %v1552_v57 = vmax.f32 %v3390_v12, 0.0 }
 0x352   : > { %v1317_v5 = vpop.f32.mrf.mxu0  ;;  %v1561_v30 = vmax.f32 %v1393_v31, 0.0  ;;  %v3400_v48 = vadd.f32 %v1394_v33, %v3384_v11 }
 0x353   : > { %v1559_v13 = vmax.f32 %v3395_v18, 0.0  ;;  %v3404_v21 = vadd.f32 %v1317_v5, %v3384_v11 }
 0x354   : > { %v1581_v56 = vadd.f32 %v1561_v30, %v1553_v4  ;;  %v1562_v34 = vmax.f32 %v3400_v48, 0.0 }
 0x355   : > { %v1567_v38 = vadd.f32 %v1559_v13, %v1551_v22  ;;  %v1560_v27 = vmax.f32 %v3404_v21, 0.0 }
 0x356   : > { %v1582_v55 = vrot.slane %v1581_v56, 4  ;;  %v1588_v25 = vadd.f32 %v1562_v34, %v1554_v47 }
 0x357   : > { %v1568_v28 = vrot.slane %v1567_v38, 4  ;;  %v1574_v23 = vadd.f32 %v1560_v27, %v1552_v57 }
 0x358   : > { %v1583_v14 = vadd.f32 %v1582_v55, %v1581_v56  ;;  %v1589_v41 = vrot.slane %v1588_v25, 4 }
 0x359   : > { %v1569_v49 = vadd.f32 %v1568_v28, %v1567_v38  ;;  %v1575_v19 = vrot.slane %v1574_v23, 4 }
 0x35a   : > { %v1584_v53 = vrot.slane %v1583_v14, 2  ;;  %v1590_v24 = vadd.f32 %v1589_v41, %v1588_v25 }
 0x35b   : > { %v1570_v50 = vrot.slane %v1569_v49, 2  ;;  %v1576_v29 = vadd.f32 %v1575_v19, %v1574_v23 }
 0x35c   : > { %v1585_v54 = vadd.f32 %v1584_v53, %v1583_v14  ;;  %v1591_v39 = vrot.slane %v1590_v24, 2 }
 0x35d   : > { %v1571_v59 = vadd.f32 %v1570_v50, %v1569_v49  ;;  %v1577_v1 = vrot.slane %v1576_v29, 2 }
 0x35e   : > { %v1586_v37 = vrot.slane %v1585_v54, 1  ;;  %v1592_v52 = vadd.f32 %v1591_v39, %v1590_v24  ;;  %v1540_v32 = vpop.f32.mrf.mxu1 }
 0x35f   : > { %v1572_v43 = vrot.slane %v1571_v59, 1  ;;  %v1578_v60 = vadd.f32 %v1577_v1, %v1576_v29  ;;  %v1463_v42 = vpop.f32.mrf.mxu0  ;;  %v3414_v46 = vadd.f32 %v1540_v32, %v3376_v58 }
 0x360   : > { %v1587_v0 = vadd.f32 %v1586_v37, %v1585_v54  ;;  %v1593_v3 = vrot.slane %v1592_v52, 1  ;;  %v3417_v9 = vadd.f32 %v1463_v42, %v3376_v58  ;;  %v1542_v17 = vpop.f32.mrf.mxu1 }
 0x361   : > { %v1573_v61 = vadd.f32 %v1572_v43, %v1571_v59  ;;  %v1579_v16 = vrot.slane %v1578_v60, 1  ;;  %v1465_v20 = vpop.f32.mrf.mxu0  ;;  %v1557_v51 = vmax.f32 %v3414_v46, 0.0  ;;  %v3421_v35 = vadd.f32 %v1542_v17, %v3376_v58 }
 0x362   : > { %v1625_v8 = vmul.f32 0.0625, %v1587_v0  ;;  %v1594_v26 = vadd.f32 %v1593_v3, %v1592_v52  ;;  %v1555_v63 = vmax.f32 %v3417_v9, 0.0  ;;  %v3425_v7 = vadd.f32 %v1465_v20, %v3376_v58  ;;  %v1546_v45 = vpop.f32.mrf.mxu1 }
 0x363   : > { %v1623_v62 = vmul.f32 0.0625, %v1573_v61  ;;  %v1580_v2 = vadd.f32 %v1579_v16, %v1578_v60  ;;  %v1469_v44 = vpop.f32.mrf.mxu0  ;;  %v1558_v10 = vmax.f32 %v3421_v35, 0.0  ;;  %v3429_v12 = vadd.f32 %v1546_v45, %v3384_v11 }
 0x364   : > { %v3431_v6 = vsub.f32 %v1553_v4, %v1625_v8  ;;  %v3433_v40 = vsub.f32 %v1561_v30, %v1625_v8  ;;  %v1626_v31 = vmul.f32 0.0625, %v1594_v26  ;;  %v1556_v33 = vmax.f32 %v3425_v7, 0.0  ;;  %v1548_v14 = vpop.f32.mrf.mxu1 }
 0x365   : > { %v3436_v5 = vsub.f32 %v1551_v22, %v1623_v62  ;;  %v1624_v58 = vmul.f32 0.0625, %v1580_v2  ;;  %v3439_v48 = vadd.f32 %v1469_v44, %v3384_v11  ;;  %v1471_v21 = vpop.f32.mrf.mxu0  ;;  %v1565_v56 = vmax.f32 %v3429_v12, 0.0 }
 0x366   : > { %v1649_v38 = vmul.f32 %v3431_v6, %v3431_v6  ;;  %v1657_v4 = vmul.f32 %v3433_v40, %v3433_v40  ;;  %v3448_v30 = vsub.f32 %v1554_v47, %v1626_v31  ;;  %v3450_v55 = vsub.f32 %v1562_v34, %v1626_v31 }
 0x367   : > { %v1647_v22 = vmul.f32 %v3436_v5, %v3436_v5  ;;  %v3454_v25 = vsub.f32 %v1552_v57, %v1624_v58  ;;  %v3456_v28 = vsub.f32 %v1560_v27, %v1624_v58  ;;  %v1563_v23 = vmax.f32 %v3439_v48, 0.0 }
 0x368   : > { %v1677_v41 = vadd.f32 %v1657_v4, %v1649_v38  ;;  %v1650_v49 = vmul.f32 %v3448_v30, %v3448_v30  ;;  %v1658_v36 = vmul.f32 %v3450_v55, %v3450_v55  ;;  %v3464_v47 = vadd.f32 %v1471_v21, %v3384_v11 }
 0x369   : > { %v1648_v34 = vmul.f32 %v3454_v25, %v3454_v25  ;;  %v1656_v57 = vmul.f32 %v3456_v28, %v3456_v28  ;;  %v1595_v27 = vadd.f32 %v1563_v23, %v1555_v63  ;;  %v1609_v19 = vadd.f32 %v1565_v56, %v1557_v51 }
 0x36a   : > { %v1678_v53 = vrot.slane %v1677_v41, 4  ;;  %v1684_v24 = vadd.f32 %v1658_v36, %v1650_v49  ;;  %v1564_v50 = vmax.f32 %v3464_v47, 0.0  ;;  %v3480_v29 = vadd.f32 %v1548_v14, %v3384_v11 }
 0x36b   : > { %v1670_v54 = vadd.f32 %v1656_v57, %v1648_v34  ;;  %v1596_v39 = vrot.slane %v1595_v27, 4  ;;  %v1610_v59 = vrot.slane %v1609_v19, 4  ;;  %v3484_v1 = vsub.f32 %v1559_v13, %v1623_v62 }
 0x36c   : > { %v1679_v37 = vadd.f32 %v1678_v53, %v1677_v41  ;;  %v1685_v52 = vrot.slane %v1684_v24, 4  ;;  %v1602_v32 = vadd.f32 %v1564_v50, %v1556_v33  ;;  %v1566_v43 = vmax.f32 %v3480_v29, 0.0 }
 0x36d   : > { %v1671_v60 = vrot.slane %v1670_v54, 4  ;;  %v1597_v42 = vadd.f32 %v1596_v39, %v1595_v27  ;;  %v1611_v11 = vadd.f32 %v1610_v59, %v1609_v19  ;;  %v1655_v0 = vmul.f32 %v3484_v1, %v3484_v1 }
 0x36e   : > { %v1680_v3 = vrot.slane %v1679_v37, 2  ;;  %v1686_v17 = vadd.f32 %v1685_v52, %v1684_v24  ;;  %v1603_v18 = vrot.slane %v1602_v32, 4  ;;  %v1616_v13 = vadd.f32 %v1566_v43, %v1558_v10 }
 0x36f   : > { %v1672_v61 = vadd.f32 %v1671_v60, %v1670_v54  ;;  %v1598_v16 = vrot.slane %v1597_v42, 2  ;;  %v1612_v20 = vrot.slane %v1611_v11, 2  ;;  %v1663_v8 = vadd.f32 %v1655_v0, %v1647_v22 }
 0x370   : > { %v1681_v26 = vadd.f32 %v1680_v3, %v1679_v37  ;;  %v1687_v45 = vrot.slane %v1686_v17, 2  ;;  %v1604_v62 = vadd.f32 %v1603_v18, %v1602_v32  ;;  %v1617_v2 = vrot.slane %v1616_v13, 4 }
 0x371   : > { %v1673_v44 = vrot.slane %v1672_v61, 2  ;;  %v1599_v31 = vadd.f32 %v1598_v16, %v1597_v42  ;;  %v1613_v58 = vadd.f32 %v1612_v20, %v1611_v11  ;;  %v1664_v21 = vrot.slane %v1663_v8, 4 }
 0x372   : > { %v1682_v38 = vrot.slane %v1681_v26, 1  ;;  %v1688_v4 = vadd.f32 %v1687_v45, %v1686_v17  ;;  %v1605_v14 = vrot.slane %v1604_v62, 2  ;;  %v1618_v41 = vadd.f32 %v1617_v2, %v1616_v13 }
 0x373   : > { %v1674_v49 = vadd.f32 %v1673_v44, %v1672_v61  ;;  %v1600_v36 = vrot.slane %v1599_v31, 1  ;;  %v1614_v34 = vrot.slane %v1613_v58, 1  ;;  %v1665_v57 = vadd.f32 %v1664_v21, %v1663_v8 }
 0x374   : > { %v1683_v27 = vadd.f32 %v1682_v38, %v1681_v26  ;;  %v1689_v19 = vrot.slane %v1688_v4, 1  ;;  %v1606_v53 = vadd.f32 %v1605_v14, %v1604_v62  ;;  %v1619_v22 = vrot.slane %v1618_v41, 2 }
 0x375   : > { %v1675_v24 = vrot.slane %v1674_v49, 1  ;;  %v1601_v54 = vadd.f32 %v1600_v36, %v1599_v31  ;;  %v1615_v39 = vadd.f32 %v1614_v34, %v1613_v58  ;;  %v1666_v59 = vrot.slane %v1665_v57, 2 }
 0x376   : > { %v1721_v37 = vmul.f32 0.0625, %v1683_v27  ;;  %v1690_v52 = vadd.f32 %v1689_v19, %v1688_v4  ;;  %v1607_v32 = vrot.slane %v1606_v53, 1  ;;  %v1620_v60 = vadd.f32 %v1619_v22, %v1618_v41  ;;  %v3533_v4 = vpop.permute.xlu1 %1760 }
 0x377   : > { %v1676_v42 = vadd.f32 %v1675_v24, %v1674_v49  ;;  %v1627_v11 = vmul.f32 0.0625, %v1601_v54  ;;  %v1629_v0 = vmul.f32 0.0625, %v1615_v39  ;;  %v1667_v3 = vadd.f32 %v1666_v59, %v1665_v57 }
 0x378   : > { %v1729_v17 = vadd.f32 1e-05, %v1721_v37  ;;  %v1722_v18 = vmul.f32 0.0625, %v1690_v52  ;;  %v1608_v13 = vadd.f32 %v1607_v32, %v1606_v53  ;;  %v1621_v61 = vrot.slane %v1620_v60, 1 }
 0x379   : > { %v1720_v16 = vmul.f32 0.0625, %v1676_v42  ;;  %v3499_v20 = vsub.f32 %v1555_v63, %v1627_v11  ;;  %v3503_v8 = vsub.f32 %v1563_v23, %v1627_v11  ;;  %v3507_v26 = vsub.f32 %v1557_v51, %v1629_v0 }
 0x37a   : > { %2279 = vrsqrt.f32 %v1729_v17  ;;  %v1730_v45 = vadd.f32 1e-05, %v1722_v18  ;;  %v1628_v62 = vmul.f32 0.0625, %v1608_v13  ;;  %v3511_v2 = vsub.f32 %v1565_v56, %v1629_v0  ;;  %v3547_v59 = vpop.permute.xlu1 %1784 }
 0x37b   : > { %v1728_v44 = vadd.f32 1e-05, %v1720_v16  ;;  %v1651_v9 = vmul.f32 %v3499_v20, %v3499_v20  ;;  %v1659_v63 = vmul.f32 %v3503_v8, %v3503_v8  ;;  %v1653_v48 = vmul.f32 %v3507_v26, %v3507_v26 }
 0x37c   : > { %2281 = vrsqrt.f32 %v1730_v45  ;;  %v3521_v46 = vsub.f32 %v1556_v33, %v1628_v62  ;;  %v3525_v51 = vsub.f32 %v1564_v50, %v1628_v62  ;;  %v1661_v12 = vmul.f32 %v3511_v2, %v3511_v2 }
 0x37d   : > { %2283 = vrsqrt.f32 %v1728_v44  ;;  %v1691_v56 = vadd.f32 %v1659_v63, %v1651_v9  ;;  %v1622_v23 = vadd.f32 %v1621_v61, %v1620_v60  ;;  %v1668_v31 = vrot.slane %v1667_v3, 1 }
 0x37e   : > { %v1652_v58 = vmul.f32 %v3521_v46, %v3521_v46  ;;  %v1660_v21 = vmul.f32 %v3525_v51, %v3525_v51  ;;  %v1705_v7 = vadd.f32 %v1661_v12, %v1653_v48  ;;  %v3555_v48 = vpop.permute.xlu1 %1788  ;;  %v3557_v12 = vpop.permute.xlu0 %1764 }
 0x37f   : > { %v1692_v33 = vrot.slane %v1691_v56, 4  ;;  %v1630_v38 = vmul.f32 0.0625, %v1622_v23  ;;  %v1669_v47 = vadd.f32 %v1668_v31, %v1667_v3 }
 0x380   : > { %v1698_v50 = vadd.f32 %v1660_v21, %v1652_v58  ;;  %v1706_v14 = vrot.slane %v1705_v7, 4 }
 0x381   : > { %v1693_v41 = vadd.f32 %v1692_v33, %v1691_v56  ;;  %v3537_v49 = vsub.f32 %v1558_v10, %v1630_v38  ;;  %v3541_v36 = vsub.f32 %v1566_v43, %v1630_v38  ;;  %v1719_v34 = vmul.f32 0.0625, %v1669_v47 }
 0x382   : > { %v1699_v57 = vrot.slane %v1698_v50, 4  ;;  %v1707_v27 = vadd.f32 %v1706_v14, %v1705_v7 }
 0x383   : > { %v1694_v19 = vrot.slane %v1693_v41, 2  ;;  %v1654_v53 = vmul.f32 %v3537_v49, %v3537_v49  ;;  %v1662_v22 = vmul.f32 %v3541_v36, %v3541_v36  ;;  %v1727_v24 = vadd.f32 1e-05, %v1719_v34 }
 0x384   : > { %v1700_v54 = vadd.f32 %v1699_v57, %v1698_v50  ;;  %v1708_v39 = vrot.slane %v1707_v27, 2 }
 0x385   : > { %v1695_v35 = vadd.f32 %v1694_v19, %v1693_v41  ;;  %v1712_v10 = vadd.f32 %v1662_v22, %v1654_v53  ;;  %2285 = vrsqrt.f32 %v1727_v24  ;;  %v3580_v22 = vpop.permute.xlu0 %1808 }
 0x386   : > { %v1701_v29 = vrot.slane %v1700_v54, 2  ;;  %v1709_v43 = vadd.f32 %v1708_v39, %v1707_v27  ;;  %v3576_v27 = vpop.permute.xlu1 %1812 }
 0x387   : > { %v2280_v37 = vpop.eup %2279  ;;  %v1696_v52 = vrot.slane %v1695_v35, 1  ;;  %v1713_v32 = vrot.slane %v1712_v10, 4 }
 0x388   : > { %v1753_v60 = vmul.f32 %v2280_v37, %v3433_v40  ;;  %v1702_v42 = vadd.f32 %v1701_v29, %v1700_v54  ;;  %v1710_v11 = vrot.slane %v1709_v43, 1  ;;  %v1745_v3 = vmul.f32 %v2280_v37, %v3431_v6 }
 0x389   : > { %v2282_v0 = vpop.eup %2281  ;;  %v1697_v17 = vadd.f32 %v1696_v52, %v1695_v35  ;;  %v1714_v18 = vadd.f32 %v1713_v32, %v1712_v10  ;;  %v3775_v32 = vlaneseq }
 0x38a   : > { %v2284_v13 = vpop.eup %2283  ;;  %v1746_v61 = vmul.f32 %v2282_v0, %v3448_v30  ;;  %v1754_v16 = vmul.f32 %v2282_v0, %v3450_v55  ;;  %v1703_v45 = vrot.slane %v1702_v42, 1  ;;  %v1711_v62 = vadd.f32 %v1710_v11, %v1709_v43 }
 0x38b   : > { %v1744_v44 = vmul.f32 %v2284_v13, %v3454_v25  ;;  %v1752_v9 = vmul.f32 %v2284_v13, %v3456_v28  ;;  %v1723_v40 = vmul.f32 0.0625, %v1697_v17  ;;  %v1715_v63 = vrot.slane %v1714_v18, 2 }
 0x38c   : > { %v1704_v6 = vadd.f32 %v1703_v45, %v1702_v42  ;;  %v1725_v56 = vmul.f32 0.0625, %v1711_v62  ;;  %v1777_v30 = vmul.f32 %v3557_v12, %v1753_v60  ;;  %v1778_v55 = vmul.f32 %v3557_v12, %v1754_v16 }
 0x38d   : > { %v1731_v23 = vadd.f32 1e-05, %v1723_v40  ;;  %v1716_v31 = vadd.f32 %v1715_v63, %v1714_v18  ;;  %v1776_v25 = vmul.f32 %v3557_v12, %v1752_v9  ;;  %v1768_v28 = vmul.f32 %v3533_v4, %v1744_v44 }
 0x38e   : > { %v1724_v58 = vmul.f32 0.0625, %v1704_v6  ;;  %v1733_v21 = vadd.f32 1e-05, %v1725_v56  ;;  %v1769_v7 = vmul.f32 %v3533_v4, %v1745_v3  ;;  %v1770_v33 = vmul.f32 %v3533_v4, %v1746_v61 }
 0x38f   : > { %2287 = vrsqrt.f32 %v1731_v23  ;;  %v1717_v38 = vrot.slane %v1716_v31, 1  ;;  %v1792_v47 = vadd.f32 %v3547_v59, %v1768_v28  ;;  %v1800_v50 = vadd.f32 %v3555_v48, %v1776_v25 }
 0x390   : > { %v1732_v14 = vadd.f32 1e-05, %v1724_v58  ;;  %2289 = vrsqrt.f32 %v1733_v21  ;;  %v1793_v41 = vadd.f32 %v3547_v59, %v1769_v7  ;;  %v1794_v34 = vadd.f32 %v3547_v59, %v1770_v33 }
 0x391   : > { %v1718_v57 = vadd.f32 %v1717_v38, %v1716_v31  ;;  %v1801_v19 = vadd.f32 %v3555_v48, %v1777_v30  ;;  %v1802_v53 = vadd.f32 %v3555_v48, %v1778_v55  ;;  %v1824_v54 = vmul.f32 %v3576_v27, %v1800_v50 }
 0x392   : > { %v2286_v24 = vpop.eup %2285  ;;  %2291 = vrsqrt.f32 %v1732_v14  ;;  %v1816_v39 = vmul.f32 %v3580_v22, %v1792_v47  ;;  %v1818_v43 = vmul.f32 %v3580_v22, %v1794_v34  ;;  %v1817_v52 = vmul.f32 %v3580_v22, %v1793_v41 }
 0x393   : > { %v1726_v35 = vmul.f32 0.0625, %v1718_v57  ;;  %v1751_v10 = vmul.f32 %v2286_v24, %v3484_v1  ;;  %v1743_v29 = vmul.f32 %v2286_v24, %v3436_v5  ;;  %v1826_v37 = vmul.f32 %v3576_v27, %v1802_v53 }
 0x394   : > { %v3592_v60 = vshrl.u32 %v3775_v32, 7  ;;  %v1825_v1 = vmul.f32 %v3576_v27, %v1801_v19  ;;  %v1838_v5 = vadd.f32 %v1824_v54, %v1816_v39  ;;  %v1962_v3 = vstv %s3569_s22  ;;  %s2173_s22 = sshll.u32 %s2505_s26, 7  ;;  %s2450_s26 = smov [#allocation9]  }
 0x395   : > { %v1734_v42 = vadd.f32 1e-05, %v1726_v35  ;;  %v1775_v11 = vmul.f32 %v3557_v12, %v1751_v10  ;;  %v1767_v0 = vmul.f32 %v3533_v4, %v1743_v29  ;;  %v1852_v13 = vadd.f32 %v1826_v37, %v1818_v43  ;;  %s3678_s30 = scalar_lea.hbm %s3720_s5, %s2173_s22 }
 0x396   : > { %vm1960_vm3 = vcmp.eq.s32.totalorder %v3592_v60, 0  ;;  %v1845_v45 = vadd.f32 %v1825_v1, %v1817_v52  ;;  %vm1964_vm8 = vcmp.eq.s32.totalorder %v3592_v60, 1  ;;  %v1839_v9 = vrot.slane %v1838_v5, 4 }
 0x397   : > { %2293 = vrsqrt.f32 %v1734_v42  ;;  %v1791_v17 = vadd.f32 %v3547_v59, %v1767_v0  ;;  %v1799_v18 = vadd.f32 %v3555_v48, %v1775_v11  ;;  %v1963_v62 = vsel %vm1960_vm3, %v1962_v3, 0 }
 0x398   : > { %v1853_v40 = vrot.slane %v1852_v13, 4  ;;  %v1967_v63 = vstv %s3587_s12  ;;  %v1846_v31 = vrot.slane %v1845_v45, 4  ;;  %v1840_v38 = vadd.f32 %v1839_v9, %v1838_v5  ;;  %s2016_s12 = sshll.u32 %s235_s27, 4  ;;  %s2017_s12 = int_to_ptr.vmem [resolvable:$true] %s2016_s12 }
 0x399   : > { %v1823_v61 = vmul.f32 %v3576_v27, %v1799_v18  ;;  %v1815_v16 = vmul.f32 %v3580_v22, %v1791_v17  ;;  %v3609_v58 = vsel %vm1964_vm8, %v1967_v63, %v1963_v62  ;;  %vm1969_vm9 = vcmp.eq.s32.totalorder %v3592_v60, 2  ;;  %s2361_s6 = scalar_lea.vmem %s2017_s12, 128 }
 0x39a   : > { %v1854_v47 = vadd.f32 %v1853_v40, %v1852_v13  ;;  %v1847_v34 = vadd.f32 %v1846_v31, %v1845_v45  ;;  %v1841_v54 = vrot.slane %v1840_v38, 2  ;;  %v1972_v63 = vstv %s3624_s14  ;;  %p2362_p13 = scmp.ne.s32.totalorder %s2017_s12, %s2361_s6 }
 0x39b   : > { %v1831_v44 = vadd.f32 %v1823_v61, %v1815_v16  ;;  %vm1974_vm10 = vcmp.eq.s32.totalorder %v3592_v60, 3  ;;  %vm1979_vm11 = vcmp.eq.s32.totalorder %v3592_v60, 4  ;;  %vm1984_vm12 = vcmp.eq.s32.totalorder %v3592_v60, 5 }
 0x39c   : > { %v2288_v6 = vpop.eup %2287  ;;  %v1855_v39 = vrot.slane %v1854_v47, 2  ;;  %v1848_v11 = vrot.slane %v1847_v34, 2  ;;  %v1842_v16 = vadd.f32 %v1841_v54, %v1840_v38  ;;  %vm1989_vm13 = vcmp.eq.s32.totalorder %v3592_v60, 6  ;;  %p2363_p2 = pnand %p2362_p13, %p3776_p8 }
 0x39d   : > { %v2290_v56 = vpop.eup %2289  ;;  %v1747_v30 = vmul.f32 %v2288_v6, %v3499_v20  ;;  %v1755_v55 = vmul.f32 %v2288_v6, %v3503_v8  ;;  %v1832_v23 = vrot.slane %v1831_v44, 4  ;;  %vm1994_vm14 = vcmp.eq.s32.totalorder %v3592_v60, 7 }
 0x39e   : > { %v1749_v25 = vmul.f32 %v2290_v56, %v3507_v26  ;;  %v1757_v28 = vmul.f32 %v2290_v56, %v3511_v2  ;;  %v1856_v61 = vadd.f32 %v1855_v39, %v1854_v47  ;;  %v1843_v31 = vrot.slane %v1842_v16, 1  ;;  %p2364_p12 = pneg %p2363_p2 }
 0x39f   : > { %v2292_v21 = vpop.eup %2291  ;;  %v1779_v7 = vmul.f32 %v3557_v12, %v1755_v55  ;;  %v1771_v33 = vmul.f32 %v3533_v4, %v1747_v30  ;;  %v1833_v41 = vadd.f32 %v1832_v23, %v1831_v44  ;;  %v1977_v47 = vstv %s3639_s28  ;;  %s2003_s28 = scalar_lea.sflag [#allocation6], %s2591_s7 }
 0x3a0   : > { %v1748_v20 = vmul.f32 %v2292_v21, %v3521_v46  ;;  %v1756_v8 = vmul.f32 %v2292_v21, %v3525_v51  ;;  %v1781_v50 = vmul.f32 %v3557_v12, %v1757_v28  ;;  %v1773_v26 = vmul.f32 %v3533_v4, %v1749_v25 }
 0x3a1   : > { %v1795_v2 = vadd.f32 %v3547_v59, %v1771_v33  ;;  %v1803_v14 = vadd.f32 %v3555_v48, %v1779_v7  ;;  %v1834_v3 = vrot.slane %v1833_v41, 2  ;;  %v1857_v30 = vrot.slane %v1856_v61, 1 }
 0x3a2   : > { %v1780_v57 = vmul.f32 %v3557_v12, %v1756_v8  ;;  %v1772_v19 = vmul.f32 %v3533_v4, %v1748_v20  ;;  %v1797_v53 = vadd.f32 %v3547_v59, %v1773_v26  ;;  %v1805_v46 = vadd.f32 %v3555_v48, %v1781_v50 }
 0x3a3   : > { %v1827_v51 = vmul.f32 %v3576_v27, %v1803_v14  ;;  %v1819_v24 = vmul.f32 %v3580_v22, %v1795_v2  ;;  %v1835_v40 = vadd.f32 %v1834_v3, %v1833_v41  ;;  %v1858_v33 = vadd.f32 %v1857_v30, %v1856_v61 }
 0x3a4   : > { %v2294_v35 = vpop.eup %2293  ;;  %v1796_v10 = vadd.f32 %v3547_v59, %v1772_v19  ;;  %v1804_v29 = vadd.f32 %v3555_v48, %v1780_v57  ;;  %v1829_v43 = vmul.f32 %v3576_v27, %v1805_v46  ;;  %v1821_v37 = vmul.f32 %v3580_v22, %v1797_v53 }
 0x3a5   : > { %v1750_v52 = vmul.f32 %v2294_v35, %v3537_v49  ;;  %v1758_v32 = vmul.f32 %v2294_v35, %v3541_v36  ;;  %v1859_v42 = vadd.f32 %v1827_v51, %v1819_v24  ;;  %v1836_v21 = vrot.slane %v1835_v40, 1 }
 0x3a6   : > { %v1828_v0 = vmul.f32 %v3576_v27, %v1804_v29  ;;  %v1820_v1 = vmul.f32 %v3580_v22, %v1796_v10  ;;  %v1873_v5 = vadd.f32 %v1829_v43, %v1821_v37  ;;  %v2449_v8 = vmov 1966171168  }
 0x3a7   : > { %v1782_v17 = vmul.f32 %v3557_v12, %v1758_v32  ;;  %v1774_v18 = vmul.f32 %v3533_v4, %v1750_v52  ;;  %v1860_v13 = vrot.slane %v1859_v42, 4  ;;  %v1849_v12 = vadd.f32 %v1848_v11, %v1847_v34  ;;  %v1889_v34 = vpop.permute.xlu1 %1888 }
 0x3a8   : > { %v1866_v49 = vadd.f32 %v1828_v0, %v1820_v1  ;;  %v1874_v36 = vrot.slane %v1873_v5, 4  ;;  %v1912_v50 = vunpack.c.l.s4 %v2449_v8  ;;  %v1844_v2 = vadd.f32 %v1843_v31, %v1842_v16 }
 0x3a9   : > { %v1798_v45 = vadd.f32 %v3547_v59, %v1774_v18  ;;  %v1806_v62 = vadd.f32 %v3555_v48, %v1782_v17  ;;  %v1861_v44 = vadd.f32 %v1860_v13, %v1859_v42  ;;  %v1850_v25 = vrot.slane %v1849_v12, 1 }
 0x3aa   : > { %v1867_v9 = vrot.slane %v1866_v49, 4  ;;  %v1875_v4 = vadd.f32 %v1874_v36, %v1873_v5  ;;  %v1894_v51 = vadd.f32 %v1889_v34, %v1858_v33  ;;  %v1982_v24 = vstv %s3648_s8  ;;  %s2365_s8 = sshll.u32 %s2450_s26, 4  ;;  %s2366_s8 = int_to_ptr.vmem [resolvable:$false] %s2365_s8 }
 0x3ab   : > { %v1830_v6 = vmul.f32 %v3576_v27, %v1806_v62  ;;  %v1822_v56 = vmul.f32 %v3580_v22, %v1798_v45  ;;  %v1862_v55 = vrot.slane %v1861_v44, 2  ;;  %v1973_v27 = vsel %vm1969_vm9, %v1972_v63, %v3609_v58  ;;  %s2367_s10 = scalar_lea.vmem %s2366_s8, 256  ;;  %p2368_p1 = scmp.lt.s32.totalorder %s2017_s12, %s2366_s8 }
 0x3ac   : > { %v1868_v59 = vadd.f32 %v1867_v9, %v1866_v49  ;;  %v1876_v23 = vrot.slane %v1875_v4, 2  ;;  %v1851_v14 = vadd.f32 %v1850_v25, %v1849_v12  ;;  %v1837_v58 = vadd.f32 %v1836_v21, %v1835_v40  ;;  %p2369_p7 = scmp.lt.s32.totalorder %s2367_s10, %s2361_s6 }
 0x3ad   : > { %v1880_v48 = vadd.f32 %v1830_v6, %v1822_v56  ;;  %v1863_v28 = vadd.f32 %v1862_v55, %v1861_v44  ;;  %v1978_v19 = vsel %vm1974_vm10, %v1977_v47, %v1973_v27  ;;  %v1913_v39 = vunpack.c.0.s8 %v1912_v50 }
 0x3ae   : > { %v1869_v7 = vrot.slane %v1868_v59, 2  ;;  %v1877_v38 = vadd.f32 %v1876_v23, %v1875_v4  ;;  %v1892_v29 = vadd.f32 %v1889_v34, %v1844_v2  ;;  %v1893_v43 = vadd.f32 %v1889_v34, %v1851_v14  ;;  %p2370_p4 = por %p2369_p7, %p2368_p1 }
 0x3af   : > { %v1881_v22 = vrot.slane %v1880_v48, 4  ;;  %v1864_v41 = vrot.slane %v1863_v28, 1  ;;  %v1891_v37 = vadd.f32 %v1889_v34, %v1837_v58  ;;  %v1983_v52 = vsel %vm1979_vm11, %v1982_v24, %v1978_v19 }
 0x3b0   : > { %v1870_v20 = vadd.f32 %v1869_v7, %v1868_v59  ;;  %v1878_v53 = vrot.slane %v1877_v38, 1  ;;  %v1987_v32 = vstv %s3655_s11  ;;  %v1908_v1 = vcombine.low %v1893_v43, %v1894_v51  ;;  %p2371_p5 = pnand %p2370_p4, %p2364_p12 }
 0x3b1   : > { %v1882_v26 = vadd.f32 %v1881_v22, %v1880_v48  ;;  %v1865_v35 = vadd.f32 %v1864_v41, %v1863_v28  ;;  %v1907_v17 = vcombine.low %v1891_v37, %v1892_v29  ;;  %v1916_v18 = vsub.s32 %v1913_v39, %v3592_v60 }
 0x3b2   : > { %v1871_v57 = vrot.slane %v1870_v20, 1  ;;  %v1879_v42 = vadd.f32 %v1878_v53, %v1877_v38  ;;  %v1988_v13 = vsel %vm1984_vm12, %v1987_v32, %v1983_v52  ;;  %v1992_v61 = vstv %s3662_s16 }
 0x3b3   : > { %v1883_v46 = vrot.slane %v1882_v26, 2  ;;  %v1895_v3 = vadd.f32 %v1889_v34, %v1865_v35  ;;  %v1924_v45 = vrot.slane %v1908_v1, %v1916_v18  ;;  %v1917_v44 = vrot.slane %v1907_v17, %v1916_v18 }
 0x3b4   : > { %v1872_v54 = vadd.f32 %v1871_v57, %v1870_v20  ;;  %v1897_v49 = vadd.f32 %v1889_v34, %v1879_v42  ;;  %v1993_v12 = vsel %vm1989_vm13, %v1992_v61, %v1988_v13  ;;  %v1997_v9 = vstv %s1996_s21 }
 0x3b5   : > { %v1884_v10 = vadd.f32 %v1883_v46, %v1882_v26  ;;  %v1939_v63 = vcombine.low %v1917_v44, %v1924_v45  ;;  %v1998_v56 = vsel %vm1994_vm14, %v1997_v9, %v1993_v12 }
 0x3b6   : > { %v1896_v0 = vadd.f32 %v1889_v34, %v1872_v54  ;;  %vm1999_vm15 = vcmp.ge.s32.totalorder %v2670_v15, %v1998_v56 }
 0x3b7   : > { %v1885_v11 = vrot.slane %v1884_v10, 1  ;;  %v1947_v30 = vrot.slane %v1939_v63, %v1916_v18 }
 0x3b8   : > { %v1909_v16 = vcombine.low %v1895_v3, %v1896_v0 }
 0x3b9   : > { %v1886_v5 = vadd.f32 %v1885_v11, %v1884_v10 }
 0x3ba   : > { %v1931_v4 = vrot.slane %v1909_v16, %v1916_v18 }
 0x3bb   : > { %v1898_v36 = vadd.f32 %v1889_v34, %v1886_v5 }
 0x3bd   : > { %v1910_v62 = vcombine.low %v1897_v49, %v1898_v36 }
 0x3bf   : > { %v1938_v40 = vrot.slane %v1910_v62, %v1916_v18 }
 0x3c1   : > { %v1940_v6 = vcombine.low %v1931_v4, %v1938_v40 }
 0x3c3   : > { %v1954_v55 = vrot.slane %v1940_v6, %v1916_v18 }
 0x3c5   : > { %v1955_v59 = vcombine.low %v1947_v30, %v1954_v55 }
 0x3c7   : > { %v2000_v60 = vsel %vm1999_vm15, 0.0, %v1955_v59 }
 0x3c8   : > { %2001 = vst [vmem:[%s235_s27] sm:$0xff] %v2000_v60 }
 0x3c9   : > { %2374 = shalt.err (!%p2371_p5)
}
 0x3ca   : > { %s2375_s11 = scalar_lea.hbm %s3678_s30, 128  ;;  %s2379_s16 = scalar_lea.hbm %s3720_s5, 256 }
 0x3cb   : > { %p2376_p10 = scmp.ne.s32.totalorder %s3678_s30, %s2375_s11  ;;  %p2380_p6 = scmp.lt.s32.totalorder %s3678_s30, %s3720_s5 }
 0x3cc   : > { %p2381_p9 = scmp.lt.s32.totalorder %s2379_s16, %s2375_s11 }
 0x3cd   : > { %p2377_p0 = pnand %p2376_p10, %p3776_p8 }
 0x3ce   : > { %p2382_p11 = por %p2381_p9, %p2380_p6 }
 0x3cf   : > { %p2378_p3 = pneg %p2377_p0 }
 0x3d1   : > { %p2383_p13 = pnand %p2382_p11, %p2378_p3 }
 0x3d3   : > { %2386 = shalt.err (!%p2383_p13)
}
 0x3d4   : > { %2183 = dma.vmem_to_hbm [thread:$0]  (%p3776_p8), %s2017_s12, 128, %s3678_s30, %s2003_s28  }
 0x3d5 PF: > { %s2028_s19 = sand.u32 1, %s2419_s23   ;;  %p3777_p2 = scmp.ne.s32.totalorder %s3745_s29, 0 }
 0x3d6   : > { %p3778_p12 = scmp.ge.s32.totalorder %s2431_s25, 2  ;;  %s2029_s22 = scalar_lea.sflag [#allocation6], %s2028_s19 }
 0x3d8   : > { %p2194_p1 = pnand %p3778_p12, %p3777_p2 }
 0x3da   : > { %p2195_p7 = pneg %p2194_p1 }
 0x3dc   : > { %2414 = dma.done.wait (%p2195_p7), %s2029_s22, 128  }
 0x3dd   : > { %2416 = vsyncadd (%p2195_p7), %s2029_s22, 4294967168  ;;  %p25_p4 = scmp.ge.s32.totalorder %s2538_s9, 4   ;;  %s3779_s23 = smov %s2423_s0 }
 0x3de   : > { %s3780_s0 = smov %s2427_s24  ;;  %s3781_s24 = smov %s2555_s17 }
 0x3df   : > { %s3782_s25 = smov %s2538_s9  ;;  %27 = sbr.rel (!%p25_p4) target bundleno = 21 (0x15), region = 85 }
 0x3e4   :  { %2034 = vsyncpa [#allocation5], 1 }
 0x3e5   :  { %2036 = vsyncpa [#allocation5 + $0x1], 1 }
 0x3e6   :  { %2037 = vsyncpa [#allocation8], 1 }
 0x3e7   :  { %2038 = vsyncpa [#allocation6], 1 }
 0x3e8   :  { %2040 = vsyncpa [#allocation6 + $0x1], 1 }

</bundles_post_ra>
